<compile_context>
chip_gen: v7x
topology: tpu7x:2x2x1
jax: 0.10.0
libtpu: 0.0.40
codegen_flags: <defaults>
</compile_context>

<pallas_src>
import numpy as np

import jax
import jax.numpy as jnp
from jax.experimental import pallas as pl
from jax.experimental.pallas import tpu as pltpu


def _round_up(x, m):
    return (x + m - 1) // m * m


def _pick_out_chunk(out_rows):
    if out_rows % 256 == 0:
        return 256
    if out_rows % 128 == 0:
        return 128
    return out_rows


def _vmem_generation_caps():
    """Return (vmem_limit_bytes, tile_budget_bytes, max_tile_tokens, small_vmem_chip)."""
    cap = 64 * 1024 * 1024  # conservative fallback == v7x per-core VMEM
    try:
        cap = int(getattr(pltpu.get_tpu_info(), "vmem_capacity_bytes", cap))
    except Exception:
        pass
    if cap >= 100 * 1024 * 1024:
        # v5e / v6e: 128 MiB physical VMEM.  Explicit limit also protects
        # against v5e's 16-MiB default scoped limit.
        return 64 * 1024 * 1024, 48 * 1024 * 1024, 8192, False
    # v7x (or unknown): 64 MiB physical per TensorCore -- keep headroom.
    return 48 * 1024 * 1024, 32 * 1024 * 1024, 4096, True


def _pick_tile_tokens(hw_pad, batch, tn_upper):
    """Largest multiple of 128 that divides hw_pad, is <= tn_upper, and (when
    possible) leaves at least 2 total grid steps (v7x megacore balance)."""
    m = hw_pad // 128

    def largest_divisor(limit):
        limit = max(1, min(limit, m))
        best = 1
        for c in range(1, limit + 1):
            if m % c == 0:
                best = c
        return best

    d = largest_divisor(max(1, tn_upper // 128))
    if batch * (m // d) < 2 and m >= 2:
        d = largest_divisor(m // 2)
    return d * 128


def _make_mlp_kernel(out_rows, chunk_rows, compute_dtype, bf16_epilogue):
    """Two-layer MLP with tokens on the 128-lane axis.

    x_ref  : (C,   TILE_N)  native input dtype (cast to compute dtype in-kernel)
    w1t_ref: (H1,  C)       compute dtype
    b1_ref : (H1,  1)       float32
    w2t_ref: (OUT, H1)      compute dtype
    b2_ref : (OUT, 1)       float32
    o_ref  : (OUT, TILE_N)  output dtype
    """

    def kernel(x_ref, w1t_ref, b1_ref, w2t_ref, b2_ref, o_ref):
        x = x_ref[...].astype(compute_dtype)                               # (C, TN)
        h = jnp.dot(w1t_ref[...], x, preferred_element_type=jnp.float32)   # (H1, TN)
        # f32 bias-add fused with ReLU and the cast back to the MXU dtype.
        h = jnp.maximum(h + b1_ref[...], 0.0).astype(compute_dtype)
        # Second layer chunked over output rows: dot -> bias -> cast -> store
        # stays vreg-resident per chunk (v5e has a single vector-store slot).
        for start in range(0, out_rows, chunk_rows):
            rows = min(chunk_rows, out_rows - start)
            o = jnp.dot(w2t_ref[pl.ds(start, rows), :], h,
                        preferred_element_type=jnp.float32)                # (rows, TN)
            b2c = b2_ref[pl.ds(start, rows), :]
            if bf16_epilogue:
                o = o.astype(o_ref.dtype) + b2c.astype(o_ref.dtype)
            else:
                o = (o + b2c).astype(o_ref.dtype)
            o_ref[pl.ds(start, rows), :] = o

    return kernel


def _voxelize_mlp(x_flat, w1t, b1c, w2t, b2c, *, tile_n, out_dtype,
                  compute_dtype, bf16_epilogue, vmem_limit_bytes):
    """x_flat: (B, C, HW) with HW % tile_n == 0.  Returns (B, OUT, HW)."""
    B, C, HW = x_flat.shape
    H1 = w1t.shape[0]
    OUT = w2t.shape[0]
    num_tiles = HW // tile_n
    chunk = _pick_out_chunk(OUT)
    kernel = _make_mlp_kernel(OUT, chunk, compute_dtype, bf16_epilogue)

    return pl.pallas_call(
        kernel,
        out_shape=jax.ShapeDtypeStruct((B, OUT, HW), out_dtype),
        grid_spec=pltpu.PrefetchScalarGridSpec(
            num_scalar_prefetch=0,
            # Token-tile axis first so a B==1 workload still spreads across
            # both v7x TensorCores; both axes are independent ("parallel").
            grid=(num_tiles, B),
            in_specs=[
                pl.BlockSpec((None, C, tile_n), lambda t, b: (b, 0, t)),
                # Weights / biases are grid-invariant -> fetched once, stay
                # resident in VMEM for all grid steps.
                pl.BlockSpec((H1, C), lambda t, b: (0, 0)),
                pl.BlockSpec((H1, 1), lambda t, b: (0, 0)),
                pl.BlockSpec((OUT, H1), lambda t, b: (0, 0)),
                pl.BlockSpec((OUT, 1), lambda t, b: (0, 0)),
            ],
            out_specs=pl.BlockSpec((None, OUT, tile_n), lambda t, b: (b, 0, t)),
        ),
        compiler_params=pltpu.CompilerParams(
            dimension_semantics=("parallel", "parallel"),
            vmem_limit_bytes=vmem_limit_bytes,
        ),
    )(x_flat, w1t, b1c, w2t, b2c)


def voxelize_module_forward(x_nchw, params, *, bev_z, tile_n=None,
                            compute_dtype=jnp.bfloat16, out_dtype=None,
                            bf16_epilogue=None, output_layout="torch"):
    """Reproduces voxelize_module.forward.

    x_nchw : (B, in_dim, H, W)
    returns: (B, in_dim, H, W, bev_z)  if output_layout == "torch" (PyTorch layout)
             (B, bev_z, in_dim, H, W)  if output_layout == "native" (kernel-native;
                                       skips the trailing XLA transpose entirely)

    compute_dtype : MXU-operand dtype for x / weights (accumulation, first-layer
        bias-add and ReLU are always f32).  bf16 by default.
    out_dtype     : returned dtype; defaults to x.dtype so f32 inputs keep the f32
        module semantics.  bf16 (or fp8 e4m3 on v7x) writeback is an explicit
        opt-in that halves the dominant output HBM traffic.
    bf16_epilogue : add the 2nd-layer bias after the bf16 cast.  None = auto
        (only for bf16 compute+output on v7x; v6e users may pass True, keep
        False on v5e which has no bf16 VALU).
    """
    w1, b1, w2, b2 = params
    B, C, H, W = x_nchw.shape
    HW = H * W
    H1 = w1.shape[1]
    OUT = w2.shape[1]
    assert OUT == bev_z * C
    if out_dtype is None:
        out_dtype = x_nchw.dtype

    vmem_limit, tile_budget, gen_tn_cap, small_vmem_chip = _vmem_generation_caps()
    if bf16_epilogue is None:
        bf16_epilogue = (small_vmem_chip
                         and np.dtype(compute_dtype) == np.dtype(jnp.bfloat16)
                         and np.dtype(out_dtype) == np.dtype(jnp.bfloat16))

    # Transposed weights so tokens live on the 128-lane axis inside the kernel.
    w1t = jnp.transpose(w1).astype(compute_dtype)             # (H1, C)
    w2t = jnp.transpose(w2).astype(compute_dtype)             # (OUT, H1)
    b1c = jnp.reshape(b1, (H1, 1)).astype(jnp.float32)
    b2c = jnp.reshape(b2, (OUT, 1)).astype(jnp.float32)

    # Token-tile size: largest multiple of 128 that divides the 128-aligned
    # token count and fits the generation-aware VMEM tile budget.
    xb = np.dtype(x_nchw.dtype).itemsize
    cb = np.dtype(compute_dtype).itemsize
    ob = np.dtype(out_dtype).itemsize
    chunk = _pick_out_chunk(OUT)
    per_token = (2 * C * xb            # double-buffered input tile (native dtype)
                 + 2 * OUT * ob        # double-buffered output tile
                 + C * cb              # in-kernel cast of x
                 + H1 * (4 + cb)       # h in f32 + compute dtype
                 + 4 * chunk)          # one f32 chunk of the 2nd matmul
    budget_tn = max(128, (tile_budget // per_token) // 128 * 128)
    tn_upper = min(budget_tn, gen_tn_cap)
    if tile_n is not None:
        tn_upper = min(tn_upper, max(128, tile_n // 128 * 128))

    HW_pad = _round_up(HW, 128)
    tn = _pick_tile_tokens(HW_pad, B, tn_upper)

    # Free reshape (no permute); pad tokens only if H*W is not 128-aligned.
    x_flat = x_nchw.reshape(B, C, HW)
    if HW_pad != HW:
        x_flat = jnp.pad(x_flat, ((0, 0), (0, 0), (0, HW_pad - HW)))

    y = _voxelize_mlp(x_flat, w1t, b1c, w2t, b2c, tile_n=tn, out_dtype=out_dtype,
                      compute_dtype=compute_dtype, bf16_epilogue=bf16_epilogue,
                      vmem_limit_bytes=vmem_limit)            # (B, OUT, HW_pad)
    if HW_pad != HW:
        # Padded tokens hold post-bias/ReLU garbage; never expose them.
        y = y[:, :, :HW]

    # Output channel o = z*C + c, so (B, OUT, HW) -> (B, Z, C, H, W) is a free
    # reshape.  "native" stops here (no XLA transpose at all); "torch" matches
    # the PyTorch return layout (B, C, H, W, Z) with exactly one transpose pass.
    y = y.reshape(B, bev_z, C, H, W)
    if output_layout == "native":
        return y
    # TODO(synk): writing the Z-minor (B,C,H,W,Z) layout directly from the kernel
    # would need masked 16-lane partial stores, so the final permute stays in XLA.
    return jnp.transpose(y, (0, 2, 3, 4, 1))


def make_params(key, in_dim, bev_z, dtype=jnp.float32):
    hidden = 2 * in_dim
    out = bev_z * in_dim
    k1, k2, k3, k4 = jax.random.split(key, 4)
    # Deterministic synthetic init (nn.Linear-style uniform scaling).
    s1 = 1.0 / jnp.sqrt(in_dim)
    s2 = 1.0 / jnp.sqrt(hidden)
    w1 = jax.random.uniform(k1, (in_dim, hidden), dtype, -s1, s1)
    b1 = jax.random.uniform(k2, (hidden,), dtype, -s1, s1)
    w2 = jax.random.uniform(k3, (hidden, out), dtype, -s2, s2)
    b2 = jax.random.uniform(k4, (out,), dtype, -s2, s2)
    return w1, b1, w2, b2


if __name__ == "__main__":
    # Module defaults (bev_z=16, in_dim=48) at a small spatial/batch size.
    B, in_dim, H, W, bev_z = 2, 48, 16, 16, 16

    key = jax.random.PRNGKey(0)
    kx, kp = jax.random.split(key)
    x = jax.random.normal(kx, (B, in_dim, H, W), jnp.float32)
    params = make_params(kp, in_dim, bev_z)

    # Plain-JAX reference (same math and output layout as the PyTorch module).
    w1, b1, w2, b2 = params
    x_tok = jnp.transpose(x, (0, 2, 3, 1)).reshape(B * H * W, in_dim)
    ref = jnp.maximum(x_tok @ w1 + b1[None, :], 0.0) @ w2 + b2[None, :]
    ref = jnp.transpose(ref.reshape(B, H, W, bev_z, in_dim), (0, 4, 1, 2, 3))

    # 1) Module-equivalent dtype path: f32 operands, f32 output (default out_dtype
    #    now tracks x.dtype).  Tolerance covers platform f32-matmul modes while
    #    still validating wiring, biases and layout.
    out_f32 = voxelize_module_forward(x, params, bev_z=bev_z,
                                      compute_dtype=jnp.float32)
    out_f32 = jax.block_until_ready(out_f32)
    assert out_f32.shape == (B, in_dim, H, W, bev_z), out_f32.shape
    assert out_f32.dtype == jnp.float32
    assert jnp.allclose(out_f32, ref, atol=3e-2, rtol=3e-2), \
        float(jnp.max(jnp.abs(out_f32 - ref)))

    # 2) Default fast path: bf16 MXU operands, f32 accumulation/writeback
    #    (out_dtype defaults to the input dtype).  Loose check.
    out_def = voxelize_module_forward(x, params, bev_z=bev_z)
    out_def = jax.block_until_ready(out_def)
    assert out_def.shape == (B, in_dim, H, W, bev_z), out_def.shape
    assert out_def.dtype == jnp.float32
    assert jnp.allclose(out_def, ref, atol=0.25, rtol=0.1)

    # 3) Kernel-native layout (skips the trailing XLA transpose entirely).
    out_nat = voxelize_module_forward(x, params, bev_z=bev_z,
                                      output_layout="native")
    out_nat = jax.block_until_ready(out_nat)
    assert out_nat.shape == (B, bev_z, in_dim, H, W), out_nat.shape
    assert jnp.allclose(jnp.transpose(out_nat, (0, 2, 3, 4, 1)), out_def)

    print("KERNEL_OK")
</pallas_src>

<mosaic_0001>
module attributes {stable_mosaic.version = 11 : i64} {
  func.func @kernel(%arg0: i32, %arg1: i32, %arg2: memref<1x48x256xf32, #tpu.memory_space<vmem>>, %arg3: memref<96x48xf32, #tpu.memory_space<vmem>>, %arg4: memref<96x1xf32, #tpu.memory_space<vmem>>, %arg5: memref<768x96xf32, #tpu.memory_space<vmem>>, %arg6: memref<768x1xf32, #tpu.memory_space<vmem>>, %arg7: memref<1x768x256xf32, #tpu.memory_space<vmem>>) attributes {dimension_semantics = [#tpu.dimension_semantics<parallel>, #tpu.dimension_semantics<parallel>], iteration_bounds = array<i64: 1, 2>, scalar_prefetch = 0 : i64, scratch_operands = 0 : i64, tpu.core_type = #tpu.core_type<tc>, window_params = [{transform_indices = @transform_0, window_bounds = array<i64: 1, 48, 256>}, {pipeline_mode = #tpu.pipeline_mode<synchronous>, transform_indices = @transform_1, window_bounds = array<i64: 96, 48>}, {pipeline_mode = #tpu.pipeline_mode<synchronous>, transform_indices = @transform_2, window_bounds = array<i64: 96, 1>}, {pipeline_mode = #tpu.pipeline_mode<synchronous>, transform_indices = @transform_3, window_bounds = array<i64: 768, 96>}, {pipeline_mode = #tpu.pipeline_mode<synchronous>, transform_indices = @transform_4, window_bounds = array<i64: 768, 1>}, {transform_indices = @transform_5, window_bounds = array<i64: 1, 768, 256>}]} {
    %c0 = arith.constant 0 : index
    %c0_0 = arith.constant 0 : index
    %c0_1 = arith.constant 0 : index
    %0 = vector.load %arg2[%c0, %c0_0, %c0_1] : memref<1x48x256xf32, #tpu.memory_space<vmem>>, vector<1x48x256xf32>
    %1 = vector.shape_cast %0 : vector<1x48x256xf32> to vector<48x256xf32>
    %c0_2 = arith.constant 0 : index
    %c0_3 = arith.constant 0 : index
    %2 = vector.load %arg3[%c0_2, %c0_3] : memref<96x48xf32, #tpu.memory_space<vmem>>, vector<96x48xf32>
    %cst = arith.constant dense<0.000000e+00> : vector<96x256xf32>
    %3 = tpu.matmul %2, %1, %cst {dimension_numbers = #tpu.dot_dimension_numbers<[1], [0], [0], [1], [0, 0, 1, 1], [], []>} : vector<96x48xf32>, vector<48x256xf32>, vector<96x256xf32> -> vector<96x256xf32>
    %c0_4 = arith.constant 0 : index
    %c0_5 = arith.constant 0 : index
    %4 = vector.load %arg4[%c0_4, %c0_5] : memref<96x1xf32, #tpu.memory_space<vmem>>, vector<96x1xf32>
    %5 = vector.broadcast %4 : vector<96x1xf32> to vector<96x256xf32>
    %6 = arith.addf %3, %5 : vector<96x256xf32>
    %cst_6 = arith.constant 0.000000e+00 : f32
    %7 = vector.broadcast %cst_6 : f32 to vector<96x256xf32>
    %8 = arith.maximumf %6, %7 : vector<96x256xf32>
    %c0_7 = arith.constant 0 : index
    %c0_8 = arith.constant 0 : index
    %9 = vector.load %arg5[%c0_7, %c0_8] : memref<768x96xf32, #tpu.memory_space<vmem>>, vector<256x96xf32>
    %cst_9 = arith.constant dense<0.000000e+00> : vector<256x256xf32>
    %10 = tpu.matmul %9, %8, %cst_9 {dimension_numbers = #tpu.dot_dimension_numbers<[1], [0], [0], [1], [0, 0, 1, 1], [], []>} : vector<256x96xf32>, vector<96x256xf32>, vector<256x256xf32> -> vector<256x256xf32>
    %c0_10 = arith.constant 0 : index
    %c0_11 = arith.constant 0 : index
    %11 = vector.load %arg6[%c0_10, %c0_11] : memref<768x1xf32, #tpu.memory_space<vmem>>, vector<256x1xf32>
    %12 = vector.broadcast %11 : vector<256x1xf32> to vector<256x256xf32>
    %13 = arith.addf %10, %12 : vector<256x256xf32>
    %c0_12 = arith.constant 0 : index
    %c0_13 = arith.constant 0 : index
    %c0_14 = arith.constant 0 : index
    %14 = vector.load %arg7[%c0_12, %c0_13, %c0_14] : memref<1x768x256xf32, #tpu.memory_space<vmem>>, vector<1x256x256xf32>
    %15 = vector.shape_cast %14 : vector<1x256x256xf32> to vector<256x256xf32>
    %16 = vector.shape_cast %13 : vector<256x256xf32> to vector<1x256x256xf32>
    tpu.vector_store %arg7[%c0_12, %c0_13, %c0_14], %16 {strides = array<i32>} : memref<1x768x256xf32, #tpu.memory_space<vmem>>, vector<1x256x256xf32>,
    %c256 = arith.constant 256 : index
    %c0_15 = arith.constant 0 : index
    %17 = vector.load %arg5[%c256, %c0_15] : memref<768x96xf32, #tpu.memory_space<vmem>>, vector<256x96xf32>
    %cst_16 = arith.constant dense<0.000000e+00> : vector<256x256xf32>
    %18 = tpu.matmul %17, %8, %cst_16 {dimension_numbers = #tpu.dot_dimension_numbers<[1], [0], [0], [1], [0, 0, 1, 1], [], []>} : vector<256x96xf32>, vector<96x256xf32>, vector<256x256xf32> -> vector<256x256xf32>
    %c256_17 = arith.constant 256 : index
    %c0_18 = arith.constant 0 : index
    %19 = vector.load %arg6[%c256_17, %c0_18] : memref<768x1xf32, #tpu.memory_space<vmem>>, vector<256x1xf32>
    %20 = vector.broadcast %19 : vector<256x1xf32> to vector<256x256xf32>
    %21 = arith.addf %18, %20 : vector<256x256xf32>
    %c0_19 = arith.constant 0 : index
    %c256_20 = arith.constant 256 : index
    %c0_21 = arith.constant 0 : index
    %22 = vector.load %arg7[%c0_19, %c256_20, %c0_21] : memref<1x768x256xf32, #tpu.memory_space<vmem>>, vector<1x256x256xf32>
    %23 = vector.shape_cast %22 : vector<1x256x256xf32> to vector<256x256xf32>
    %24 = vector.shape_cast %21 : vector<256x256xf32> to vector<1x256x256xf32>
    tpu.vector_store %arg7[%c0_19, %c256_20, %c0_21], %24 {strides = array<i32>} : memref<1x768x256xf32, #tpu.memory_space<vmem>>, vector<1x256x256xf32>,
    %c512 = arith.constant 512 : index
    %c0_22 = arith.constant 0 : index
    %25 = vector.load %arg5[%c512, %c0_22] : memref<768x96xf32, #tpu.memory_space<vmem>>, vector<256x96xf32>
    %cst_23 = arith.constant dense<0.000000e+00> : vector<256x256xf32>
    %26 = tpu.matmul %25, %8, %cst_23 {dimension_numbers = #tpu.dot_dimension_numbers<[1], [0], [0], [1], [0, 0, 1, 1], [], []>} : vector<256x96xf32>, vector<96x256xf32>, vector<256x256xf32> -> vector<256x256xf32>
    %c512_24 = arith.constant 512 : index
    %c0_25 = arith.constant 0 : index
    %27 = vector.load %arg6[%c512_24, %c0_25] : memref<768x1xf32, #tpu.memory_space<vmem>>, vector<256x1xf32>
    %28 = vector.broadcast %27 : vector<256x1xf32> to vector<256x256xf32>
    %29 = arith.addf %26, %28 : vector<256x256xf32>
    %c0_26 = arith.constant 0 : index
    %c512_27 = arith.constant 512 : index
    %c0_28 = arith.constant 0 : index
    %30 = vector.load %arg7[%c0_26, %c512_27, %c0_28] : memref<1x768x256xf32, #tpu.memory_space<vmem>>, vector<1x256x256xf32>
    %31 = vector.shape_cast %30 : vector<1x256x256xf32> to vector<256x256xf32>
    %32 = vector.shape_cast %29 : vector<256x256xf32> to vector<1x256x256xf32>
    tpu.vector_store %arg7[%c0_26, %c512_27, %c0_28], %32 {strides = array<i32>} : memref<1x768x256xf32, #tpu.memory_space<vmem>>, vector<1x256x256xf32>,
    return
  }
  func.func @transform_0(%arg0: i32, %arg1: i32) -> (i32, i32, i32) {
    %c0_i32 = arith.constant 0 : i32
    %c0_i32_0 = arith.constant 0 : i32
    return %arg1, %c0_i32, %arg0 : i32, i32, i32
  }
  func.func @transform_1(%arg0: i32, %arg1: i32) -> (i32, i32) {
    %c0_i32 = arith.constant 0 : i32
    %c0_i32_0 = arith.constant 0 : i32
    %c0_i32_1 = arith.constant 0 : i32
    return %c0_i32, %c0_i32_0 : i32, i32
  }
  func.func @transform_2(%arg0: i32, %arg1: i32) -> (i32, i32) {
    %c0_i32 = arith.constant 0 : i32
    %c0_i32_0 = arith.constant 0 : i32
    %c0_i32_1 = arith.constant 0 : i32
    return %c0_i32, %c0_i32_0 : i32, i32
  }
  func.func @transform_3(%arg0: i32, %arg1: i32) -> (i32, i32) {
    %c0_i32 = arith.constant 0 : i32
    %c0_i32_0 = arith.constant 0 : i32
    %c0_i32_1 = arith.constant 0 : i32
    return %c0_i32, %c0_i32_0 : i32, i32
  }
  func.func @transform_4(%arg0: i32, %arg1: i32) -> (i32, i32) {
    %c0_i32 = arith.constant 0 : i32
    %c0_i32_0 = arith.constant 0 : i32
    %c0_i32_1 = arith.constant 0 : i32
    return %c0_i32, %c0_i32_0 : i32, i32
  }
  func.func @transform_5(%arg0: i32, %arg1: i32) -> (i32, i32, i32) {
    %c0_i32 = arith.constant 0 : i32
    %c0_i32_0 = arith.constant 0 : i32
    return %arg1, %c0_i32, %arg0 : i32, i32, i32
  }
}

</mosaic_0001>

<bundles_post_ra>
// kernel: tpu_custom_call.1
= control target key start
LH: loop header
LB: loop body
LE: loop exit
PB: predicated region body
PF: predicated region fallthrough
CT: control target
= control target key end

     0   :  { %10 = vsyncpa [#allocation3], 0  ;;  %s4611_s0 = inlined_call_operand.hbm [shape: f32[2,48,256], index: 0, kind: input, shape index: {}]   ;;  %s4612_s1 = inlined_call_operand.vmem [shape: f32[96,48], index: 1, kind: input, shape index: {}]   ;;  %s4613_s2 = inlined_call_operand.vmem [shape: f32[96,1], index: 2, kind: input, shape index: {}]   ;;  %s4614_s3 = inlined_call_operand.vmem [shape: f32[768,96], index: 3, kind: input, shape index: {}]   ;;  %s4615_s4 = inlined_call_operand.vmem [shape: f32[768,1], index: 4, kind: input, shape index: {}]   ;;  %s4616_s5 = inlined_call_operand.hbm [shape: f32[2,768,256], index: 5, kind: output, shape index: {}]  }
   0x1   :  { %12 = vsyncpa [#allocation3 + $0x1], 0 }
   0x2   :  { %13 = vsyncpa [#allocation4], 0 }
   0x3   :  { %15 = vsyncpa [#allocation4 + $0x1], 0  ;;  %s3024_s18 = smov 0   ;;  %s3026_s19 = smov 0  }
   0x4   :  { %s3028_s20 = smov 0   ;;  %s3030_s21 = smov 0  }
   0x5   :  { %s3032_s22 = smov 0   ;;  %s3034_s23 = smov 0  }
   0x6 LB: > { %s2584_s24 = sadd.s32 4294967295, %s2984_s23   ;;  %s2585_s25 = sadd.s32 4294967294, %s2984_s23   ;;  %s2984_s23 = sphi %s3034_s23, %s21_s23   ;;  %s2980_s22 = sphi %s3032_s22, %s4631_s22   ;;  %s2976_s21 = sphi %s3030_s21, %s4630_s21   ;;  %s2972_s20 = sphi %s3028_s20, %s4629_s20   ;;  %s2968_s19 = sphi %s3026_s19, %s4628_s19   ;;  %s2964_s18 = sphi %s3024_s18, %s4627_s18  }
   0x7   : > { %s30_s26 = sadd.s32 1, %s2980_s22  ;;  %s42_s27 = sadd.s32 1, %s2972_s20 }
   0x8   : > { %p31_p0 = scmp.ge.s32.totalorder %s30_s26, 2  ;;  %p49_p1 = scmp.ne.s32.totalorder %s2972_s20, %s2968_s19 }
   0x9   : > { %p50_p2 = scmp.eq.s32.totalorder %s2984_s23, 0  ;;  %p55_p3 = scmp.ne.s32.totalorder %s2968_s19, %s2964_s18 }
   0xa   : > { %s4633_s26 = smov (%p31_p0, %s30_s26), 0  ;;  %p56_p5 = scmp.eq.s32.totalorder %s2584_s24, 0 }
   0xb   : > { %p3065_p4 = por %p50_p2, %p49_p1  ;;  %s37_s29 = ssub.s32 %s2980_s22, %s4633_s26 }
   0xc   : > { %p165_p6 = scmp.eq.s32.totalorder %s2584_s24, 1  ;;  %p40_p7 = scmp.eq.s32.totalorder %s37_s29, 0 }
   0xd   : > { %p3071_p8 = por %p56_p5, %p55_p3  ;;  %p171_p10 = scmp.eq.s32.totalorder %s2585_s25, 1 }
   0xe   : > { %p3075_p9 = por %p165_p6, %p49_p1  ;;  %p2814_p13 = scmp.lt.s32.totalorder %s2984_s23, 2 }
   0xf   : > { %s3080_s7 = scalar_select %p40_p7, %s2972_s20, %s42_s27  }
  0x10   : > { %s4620_s6 = scalar_select %p3075_p9, 1, 0 }
  0x11   : > { %p3082_p11 = por %p171_p10, %p55_p3  ;;  %s203_s9 = sand.u32 1, %s2972_s20  }
  0x12   : > { %s2797_s10 = smul.u32 96, %s203_s9  ;;  %p3092_p0 = pnand %p2814_p13, %p3065_p4 }
  0x13   : > { %s4621_s8 = scalar_select %p3082_p11, 1, 0 }
  0x14   : > { %s2798_s11 = smul.u32 1536, %s2980_s22  ;;  %s207_s16 = scalar_lea.vmem [#allocation2], %s2797_s10 }
  0x15   : > { %s216_s17 = sshll.u32 %s207_s16, 4  ;;  %s3104_s24 = scalar_lea.sflag [#allocation3], %s203_s9  ;;  %s3101_s17 = int_to_ptr.vmem [resolvable:$true] %s216_s17 }
  0x16   : > { %s3099_s15 = scalar_lea.hbm %s4611_s0, %s2798_s11  ;;  %p2874_p3 = pneg %p3092_p0 }
  0x17   : > { %s2872_s25 = scalar_lea.hbm %s3099_s15, 1536  ;;  %s2877_s29 = scalar_lea.hbm %s4611_s0, 3072 }
  0x18   : > { %p2873_p2 = scmp.ne.s32.totalorder %s3099_s15, %s2872_s25  ;;  %p2878_p6 = scmp.lt.u32.totalorder %s3099_s15, %s4611_s0 }
  0x19   : > { %p2879_p7 = scmp.lt.u32.totalorder %s2877_s29, %s2872_s25  ;;  %p2881_p13 = scmp.lt.u32.totalorder %s2872_s25, %s3099_s15 }
  0x1a   : > { %p2875_p4 = pnand %p2874_p3, %p2873_p2 }
  0x1b   : > { %p2880_p10 = por %p2879_p7, %p2878_p6 }
  0x1c   : > { %p2876_p5 = pneg %p2875_p4 }
  0x1d   : > { %p2882_p12 = por %p2881_p13, %p2880_p10 }
  0x1f   : > { %p2883_p1 = pnand %p2882_p12, %p2876_p5 }
  0x21   : > { %2886 = shalt.err (!%p2883_p1)
}
  0x22   : > { %s2887_s9 = scalar_lea.vmem %s3101_s17, 1536  ;;  %s2986_s13 = smov [#allocation2]  }
  0x23   : > { %p2888_p2 = scmp.ne.s32.totalorder %s3101_s17, %s2887_s9  ;;  %s2892_s14 = sshll.u32 %s2986_s13, 4  ;;  %s2893_s14 = int_to_ptr.vmem [resolvable:$false] %s2892_s14 }
  0x24   : > { %s2894_s16 = scalar_lea.vmem %s2893_s14, 3072  ;;  %p2895_p9 = scmp.lt.s32.totalorder %s3101_s17, %s2893_s14 }
  0x25   : > { %p2890_p4 = pnand %p2888_p2, %p2874_p3  ;;  %p2896_p6 = scmp.lt.s32.totalorder %s2894_s16, %s2887_s9 }
  0x27   : > { %p2891_p11 = pneg %p2890_p4  ;;  %p2897_p7 = por %p2896_p6, %p2895_p9 }
  0x29   : > { %p2898_p10 = pnand %p2897_p7, %p2891_p11 }
  0x2b   : > { %2901 = shalt.err (!%p2898_p10)
}
  0x2c   : > { %s2987_s25 = smov 256   ;;  %s2988_s27 = smov 16  }
  0x2d   : > { %2809 = dma.hbm_to_vmem [thread:$0]  (!%p3092_p0), %s3099_s15, 1536, %s3101_s17, %s3104_s24, %s2987_s25, %s2987_s25, %s2988_s27  }
  0x2e   : > { %p224_p12 = scmp.lt.s32.totalorder %s2984_s23, 3  ;;  %p4623_p1 = scmp.ge.s32.totalorder %s2984_s23, 1 }
  0x30   : > { %p225_p3 = pnand %p4623_p1, %p224_p12 }
  0x31   : > { %s3136_s28 = sand.u32 (!%p225_p3), 1, %s2968_s19  }
  0x32   : > { %228 = sbr.rel (%p225_p3) target bundleno = 779 (0x30b), region = 40  ;;  %s231_s11 = scalar_lea.sflag (!%p225_p3), [#allocation3], %s3136_s28 }
  0x33   : > { %s2799_s29 = smul.u32 (!%p225_p3), 96, %s3136_s28 }
  0x35   : > { %s3140_s10 = scalar_lea.vmem (!%p225_p3), [#allocation2], %s2799_s29 }
  0x39   : > { %2955 = dma.done.wait (%p3071_p8), %s231_s11, 1536  }
  0x3a   : > { %2957 = vsyncadd (%p3071_p8), %s231_s11, 4294965760  ;;  %v2989_v0 = vmov 0   ;;  %v2990_v1 = vmov 0.0   ;;  %v289_v2 = vld [vmem:[%s4613_s2 + $0x10] sm:$0xff]  ;;  %v287_v3 = vld [vmem:[%s4613_s2] sm:$0xff]  ;;  %vm359_vm0 = vcmask 392192  }
  0x3b   : > { %2871 = vset.pattern.permute.xlu1 %v2989_v0  ;;  %2870 = vset.pattern.permute.xlu0 %v2989_v0  ;;  %v264_v4 = vld [vmem:[%s3140_s10 + $0x8] sm:$0xff]  ;;  %v266_v5 = vld [vmem:[%s3140_s10 + $0x18] sm:$0xff]  ;;  %v263_v6 = vld [vmem:[%s3140_s10] sm:$0xff]  ;;  %vm781_vm1 = vcmask 785408   ;;  %s2800_s11 = smul.u32 1536, %s3136_s28  ;;  %p4624_p9 = scmp.ne.s32.totalorder %s4620_s6, 0 }
  0x3c   : > { %460 = vmatprep.mubr.f32.mxu0 %v2990_v1  ;;  %1008 = vmatprep.mubr.f32.mxu1 %v2990_v1  ;;  %v265_v7 = vld [vmem:[%s3140_s10 + $0x10] sm:$0xff]  ;;  %v2701_v8 = vpack.c.bf16 %v266_v5, %v264_v4  ;;  %v290_v10 = vld [vmem:[%s4613_s2 + $0x18] sm:$0xff]  ;;  %v288_v11 = vld [vmem:[%s4613_s2 + $0x8] sm:$0xff]  ;;  %s2801_s15 = smul.u32 24576, %s2976_s21  ;;  %s2482_s21 = scalar_lea.sflag [#allocation4], %s3136_s28 }
  0x3d   : > { %311 = vperm.xlu1 %2871, %v289_v2   ;;  %301 = vperm.xlu0 %2870, %v287_v3   ;;  %v2703_v9 = vpack.c.bf16 %v265_v7, %v263_v6  ;;  %v268_v12 = vld [vmem:[%s3140_s10 + $0x28] sm:$0xff]  ;;  %v270_v13 = vld [vmem:[%s3140_s10 + $0x38] sm:$0xff]  ;;  %v267_v14 = vld [vmem:[%s3140_s10 + $0x20] sm:$0xff]  ;;  %s4199_s12 = scalar_lea.vmem [#allocation5], %s2800_s11  ;;  %s2991_s13 = smov [#allocation5]  }
  0x3e   : > { %v269_v15 = vld [vmem:[%s3140_s10 + $0x30] sm:$0xff]  ;;  %2702 = vmatprep.subr.bf16.mxu0 %v2701_v8  ;;  %v2705_v16 = vpack.c.bf16 %v270_v13, %v268_v12  ;;  %v272_v17 = vld [vmem:[%s3140_s10 + $0x48] sm:$0xff]  ;;  %v274_v19 = vld [vmem:[%s3140_s10 + $0x58] sm:$0xff]  ;;  %s2497_s30 = sshll.u32 %s4199_s12, 4  ;;  %s4558_s24 = scalar_lea.hbm %s4616_s5, %s2801_s15  ;;  %s4560_s30 = int_to_ptr.vmem [resolvable:$true] %s2497_s30 }
  0x3f   : > { %2704 = vmatpush1.bf16.msra.mxu0 %v2703_v9  ;;  %v2707_v18 = vpack.c.bf16 %v269_v15, %v267_v14  ;;  %v292_v20 = vld [vmem:[%s4613_s2 + $0x28] sm:$0xff]  ;;  %v2709_v21 = vpack.c.bf16 %v274_v19, %v272_v17  ;;  %v271_v22 = vld [vmem:[%s3140_s10 + $0x40] sm:$0xff]  ;;  %v273_v23 = vld [vmem:[%s3140_s10 + $0x50] sm:$0xff]  ;;  %s2902_s9 = scalar_lea.vmem %s4560_s30, 24576  ;;  %s2906_s14 = sshll.u32 %s2991_s13, 4  ;;  %s2907_s14 = int_to_ptr.vmem [resolvable:$false] %s2906_s14 }
  0x40   : > { %2706 = vmatprep.subr.bf16.mxu0 %v2705_v16  ;;  %v291_v24 = vld [vmem:[%s4613_s2 + $0x20] sm:$0xff]  ;;  %v2711_v25 = vpack.c.bf16 %v273_v23, %v271_v22  ;;  %v294_v26 = vld [vmem:[%s4613_s2 + $0x38] sm:$0xff]  ;;  %v293_v27 = vld [vmem:[%s4613_s2 + $0x30] sm:$0xff]  ;;  %p2903_p8 = scmp.ne.s32.totalorder %s4560_s30, %s2902_s9  ;;  %s2908_s16 = scalar_lea.vmem %s2907_s14, 49152 }
  0x41   : > { %316 = vperm.xlu1 %2871, %v290_v10   ;;  %306 = vperm.xlu0 %2870, %v288_v11   ;;  %v275_v28 = vld [vmem:[%s4612_s1] sm:$0xff]  ;;  %v296_v29 = vld [vmem:[%s4613_s2 + $0x48] sm:$0xff]  ;;  %v298_v32 = vld [vmem:[%s4613_s2 + $0x58] sm:$0xff]  ;;  %p2909_p5 = scmp.lt.s32.totalorder %s4560_s30, %s2907_s14  ;;  %p2910_p13 = scmp.lt.s32.totalorder %s2908_s16, %s2902_s9 }
  0x42   : > { %v295_v30 = vld [vmem:[%s4613_s2 + $0x40] sm:$0xff]  ;;  %v276_v31 = vld [vmem:[%s4612_s1 + $0x8] sm:$0xff]  ;;  %v297_v33 = vld [vmem:[%s4613_s2 + $0x50] sm:$0xff]  ;;  %p2904_p11 = pnand %p2903_p8, %p4624_p9 }
  0x43   : > { %2708 = vmatpush1.bf16.msra.mxu0 %v2707_v18  ;;  %v277_v34 = vld [vmem:[%s4612_s1 + $0x10] sm:$0xff]  ;;  %v590_v35 = vld [vmem:[%s4615_s4 + $0x8] sm:$0xff]  ;;  %v589_v36 = vld [vmem:[%s4615_s4] sm:$0xff]  ;;  %p2911_p2 = por %p2910_p13, %p2909_p5 }
  0x44   : > { %2710 = vmatprep.subr.bf16.mxu0 %v2709_v21  ;;  %v278_v37 = vld [vmem:[%s4612_s1 + $0x18] sm:$0xff]  ;;  %v591_v39 = vld [vmem:[%s4615_s4 + $0x10] sm:$0xff]  ;;  %v279_v40 = vld [vmem:[%s4612_s1 + $0x20] sm:$0xff]  ;;  %p2905_p0 = pneg %p2904_p11 }
  0x45   : > { %326 = vperm.xlu1 %2871, %v292_v20   ;;  %321 = vperm.xlu0 %2870, %v291_v24   ;;  %v592_v38 = vld [vmem:[%s4615_s4 + $0x18] sm:$0xff]  ;;  %v594_v41 = vld [vmem:[%s4615_s4 + $0x28] sm:$0xff]  ;;  %v593_v42 = vld [vmem:[%s4615_s4 + $0x20] sm:$0xff] }
  0x46   : > { %v280_v43 = vld [vmem:[%s4612_s1 + $0x28] sm:$0xff]  ;;  %v596_v44 = vld [vmem:[%s4615_s4 + $0x38] sm:$0xff]  ;;  %v595_v45 = vld [vmem:[%s4615_s4 + $0x30] sm:$0xff]  ;;  %p2912_p4 = pnand %p2911_p2, %p2905_p0 }
  0x47   : > { %2712 = vmatpush1.bf16.msra.mxu0 %v2711_v25  ;;  %v281_v46 = vld [vmem:[%s4612_s1 + $0x30] sm:$0xff]  ;;  %v598_v47 = vld [vmem:[%s4615_s4 + $0x48] sm:$0xff]  ;;  %v597_v48 = vld [vmem:[%s4615_s4 + $0x40] sm:$0xff] }
  0x48   : > { %v282_v49 = vld [vmem:[%s4612_s1 + $0x38] sm:$0xff]  ;;  %v599_v51 = vld [vmem:[%s4615_s4 + $0x50] sm:$0xff]  ;;  %v283_v52 = vld [vmem:[%s4612_s1 + $0x40] sm:$0xff] }
  0x49   : > { %336 = vperm.xlu1 %2871, %v294_v26   ;;  %331 = vperm.xlu0 %2870, %v293_v27   ;;  %v600_v50 = vld [vmem:[%s4615_s4 + $0x58] sm:$0xff]  ;;  %v602_v53 = vld [vmem:[%s4615_s4 + $0x68] sm:$0xff]  ;;  %v601_v54 = vld [vmem:[%s4615_s4 + $0x60] sm:$0xff] }
  0x4a   : > { %2590 = vmatmul.mubr.msk.f32.vlgmr.msra.gmra.mrb[0].mxu0 %vm359_vm0, %v275_v28  ;;  %v284_v55 = vld [vmem:[%s4612_s1 + $0x48] sm:$0xff]  ;;  %v604_v56 = vld [vmem:[%s4615_s4 + $0x78] sm:$0xff]  ;;  %v603_v57 = vld [vmem:[%s4615_s4 + $0x70] sm:$0xff] }
  0x4b   : > { %466 = vmatprep.mubr.f32.mxu0 %v2990_v1  ;;  %v285_v58 = vld [vmem:[%s4612_s1 + $0x50] sm:$0xff]  ;;  %v606_v59 = vld [vmem:[%s4615_s4 + $0x88] sm:$0xff]  ;;  %v605_v60 = vld [vmem:[%s4615_s4 + $0x80] sm:$0xff] }
  0x4c   : > { %v286_v61 = vld [vmem:[%s4612_s1 + $0x58] sm:$0xff]  ;;  %v607_v63 = vld [vmem:[%s4615_s4 + $0x90] sm:$0xff]  ;;  %v610_v0 = vld [vmem:[%s4615_s4 + $0xa8] sm:$0xff] }
  0x4d   : > { %346 = vperm.xlu1 %2871, %v296_v29   ;;  %341 = vperm.xlu0 %2870, %v295_v30   ;;  %v608_v62 = vld [vmem:[%s4615_s4 + $0x98] sm:$0xff]  ;;  %v609_v2 = vld [vmem:[%s4615_s4 + $0xa0] sm:$0xff]  ;;  %v611_v4 = vld [vmem:[%s4615_s4 + $0xb0] sm:$0xff] }
  0x4e   : > { %2591 = vmatmul.mubr.msk.f32.gmra.mrb[2].mxu0 %vm359_vm0, %v276_v31  ;;  %v612_v3 = vld [vmem:[%s4615_s4 + $0xb8] sm:$0xff]  ;;  %v614_v5 = vld [vmem:[%s4615_s4 + $0xc8] sm:$0xff]  ;;  %v613_v6 = vld [vmem:[%s4615_s4 + $0xc0] sm:$0xff] }
  0x4f   : > { %472 = vmatprep.mubr.f32.mxu0 %v2990_v1  ;;  %v616_v7 = vld [vmem:[%s4615_s4 + $0xd8] sm:$0xff]  ;;  %v615_v8 = vld [vmem:[%s4615_s4 + $0xd0] sm:$0xff]  ;;  %v618_v9 = vld [vmem:[%s4615_s4 + $0xe8] sm:$0xff] }
  0x50   : > { %v617_v10 = vld [vmem:[%s4615_s4 + $0xe0] sm:$0xff]  ;;  %v620_v11 = vld [vmem:[%s4615_s4 + $0xf8] sm:$0xff]  ;;  %v619_v12 = vld [vmem:[%s4615_s4 + $0xf0] sm:$0xff] }
  0x51   : > { %356 = vperm.xlu1 %2871, %v298_v32   ;;  %351 = vperm.xlu0 %2870, %v297_v33   ;;  %v1232_v13 = vld [vmem:[%s4615_s4 + $0x108] sm:$0xff]  ;;  %v1231_v14 = vld [vmem:[%s4615_s4 + $0x100] sm:$0xff]  ;;  %v1234_v15 = vld [vmem:[%s4615_s4 + $0x118] sm:$0xff] }
  0x52   : > { %2592 = vmatmul.mubr.msk.f32.gmra.mrb[4].mxu0 %vm359_vm0, %v277_v34  ;;  %v1233_v16 = vld [vmem:[%s4615_s4 + $0x110] sm:$0xff]  ;;  %v1236_v17 = vld [vmem:[%s4615_s4 + $0x128] sm:$0xff]  ;;  %v1235_v18 = vld [vmem:[%s4615_s4 + $0x120] sm:$0xff] }
  0x53   : > { %478 = vmatprep.mubr.f32.mxu0 %v2990_v1  ;;  %v1238_v19 = vld [vmem:[%s4615_s4 + $0x138] sm:$0xff]  ;;  %v1237_v20 = vld [vmem:[%s4615_s4 + $0x130] sm:$0xff]  ;;  %v1240_v21 = vld [vmem:[%s4615_s4 + $0x148] sm:$0xff] }
  0x54   : > { %v1239_v22 = vld [vmem:[%s4615_s4 + $0x140] sm:$0xff]  ;;  %v1242_v23 = vld [vmem:[%s4615_s4 + $0x158] sm:$0xff]  ;;  %v1241_v24 = vld [vmem:[%s4615_s4 + $0x150] sm:$0xff] }
  0x55   : > { %628 = vperm.xlu1 %2871, %v590_v35   ;;  %623 = vperm.xlu0 %2870, %v589_v36   ;;  %v1244_v25 = vld [vmem:[%s4615_s4 + $0x168] sm:$0xff]  ;;  %v1243_v26 = vld [vmem:[%s4615_s4 + $0x160] sm:$0xff]  ;;  %v1246_v27 = vld [vmem:[%s4615_s4 + $0x178] sm:$0xff] }
  0x56   : > { %2593 = vmatmul.mubr.msk.f32.gmra.mrb[6].mxu0 %vm359_vm0, %v278_v37  ;;  %v1245_v28 = vld [vmem:[%s4615_s4 + $0x170] sm:$0xff]  ;;  %v1248_v29 = vld [vmem:[%s4615_s4 + $0x188] sm:$0xff]  ;;  %v1247_v30 = vld [vmem:[%s4615_s4 + $0x180] sm:$0xff] }
  0x57   : > { %484 = vmatprep.mubr.f32.mxu0 %v2990_v1  ;;  %v1250_v31 = vld [vmem:[%s4615_s4 + $0x198] sm:$0xff]  ;;  %v1249_v32 = vld [vmem:[%s4615_s4 + $0x190] sm:$0xff]  ;;  %v1252_v33 = vld [vmem:[%s4615_s4 + $0x1a8] sm:$0xff] }
  0x58   : > { %v1251_v34 = vld [vmem:[%s4615_s4 + $0x1a0] sm:$0xff]  ;;  %v1254_v35 = vld [vmem:[%s4615_s4 + $0x1b8] sm:$0xff]  ;;  %v1253_v36 = vld [vmem:[%s4615_s4 + $0x1b0] sm:$0xff] }
  0x59   : > { %638 = vperm.xlu1 %2871, %v592_v38   ;;  %633 = vperm.xlu0 %2870, %v591_v39   ;;  %v1256_v37 = vld [vmem:[%s4615_s4 + $0x1c8] sm:$0xff]  ;;  %v1255_v38 = vld [vmem:[%s4615_s4 + $0x1c0] sm:$0xff]  ;;  %v1258_v39 = vld [vmem:[%s4615_s4 + $0x1d8] sm:$0xff] }
  0x5a   : > { %2594 = vmatmul.mubr.msk.f32.gmra.mrb[8].mxu0 %vm359_vm0, %v279_v40  ;;  %v1257_v40 = vld [vmem:[%s4615_s4 + $0x1d0] sm:$0xff] }
  0x5b   : > { %490 = vmatprep.mubr.f32.mxu0 %v2990_v1 }
  0x5d   : > { %648 = vperm.xlu1 %2871, %v594_v41   ;;  %643 = vperm.xlu0 %2870, %v593_v42   ;;  %v1260_v41 = vld [vmem:[%s4615_s4 + $0x1e8] sm:$0xff]  ;;  %v1259_v42 = vld [vmem:[%s4615_s4 + $0x1e0] sm:$0xff] }
  0x5e   : > { %2595 = vmatmul.mubr.msk.f32.gmra.mrb[10].mxu0 %vm359_vm0, %v280_v43  ;;  %v1262_v43 = vld [vmem:[%s4615_s4 + $0x1f8] sm:$0xff] }
  0x5f   : > { %496 = vmatprep.mubr.f32.mxu0 %v2990_v1 }
  0x61   : > { %658 = vperm.xlu1 %2871, %v596_v44   ;;  %653 = vperm.xlu0 %2870, %v595_v45   ;;  %v1261_v44 = vld [vmem:[%s4615_s4 + $0x1f0] sm:$0xff]  ;;  %v1873_v45 = vld [vmem:[%s4615_s4 + $0x208] sm:$0xff] }
  0x62   : > { %2596 = vmatmul.mubr.msk.f32.gmra.mrb[12].mxu0 %vm359_vm0, %v281_v46  ;;  %v1872_v46 = vld [vmem:[%s4615_s4 + $0x200] sm:$0xff] }
  0x63   : > { %502 = vmatprep.mubr.f32.mxu0 %v2990_v1 }
  0x65   : > { %668 = vperm.xlu1 %2871, %v598_v47   ;;  %663 = vperm.xlu0 %2870, %v597_v48   ;;  %v1875_v47 = vld [vmem:[%s4615_s4 + $0x218] sm:$0xff]  ;;  %v1874_v48 = vld [vmem:[%s4615_s4 + $0x210] sm:$0xff] }
  0x66   : > { %2597 = vmatmul.mubr.msk.f32.gmra.mrb[14].mxu0 %vm359_vm0, %v282_v49  ;;  %v1877_v49 = vld [vmem:[%s4615_s4 + $0x228] sm:$0xff] }
  0x67   : > { %508 = vmatprep.mubr.f32.mxu0 %v2990_v1 }
  0x69   : > { %678 = vperm.xlu1 %2871, %v600_v50   ;;  %673 = vperm.xlu0 %2870, %v599_v51   ;;  %v1876_v50 = vld [vmem:[%s4615_s4 + $0x220] sm:$0xff]  ;;  %v1879_v51 = vld [vmem:[%s4615_s4 + $0x238] sm:$0xff] }
  0x6a   : > { %2598 = vmatmul.mubr.msk.f32.gmra.mrb[16].mxu0 %vm359_vm0, %v283_v52  ;;  %v1878_v52 = vld [vmem:[%s4615_s4 + $0x230] sm:$0xff] }
  0x6b   : > { %514 = vmatprep.mubr.f32.mxu0 %v2990_v1 }
  0x6d   : > { %688 = vperm.xlu1 %2871, %v602_v53   ;;  %683 = vperm.xlu0 %2870, %v601_v54   ;;  %v1881_v53 = vld [vmem:[%s4615_s4 + $0x248] sm:$0xff]  ;;  %v1880_v54 = vld [vmem:[%s4615_s4 + $0x240] sm:$0xff] }
  0x6e   : > { %2599 = vmatmul.mubr.msk.f32.gmra.mrb[18].mxu0 %vm359_vm0, %v284_v55  ;;  %v1883_v55 = vld [vmem:[%s4615_s4 + $0x258] sm:$0xff] }
  0x6f   : > { %520 = vmatprep.mubr.f32.mxu0 %v2990_v1 }
  0x71   : > { %698 = vperm.xlu1 %2871, %v604_v56   ;;  %693 = vperm.xlu0 %2870, %v603_v57   ;;  %v1882_v56 = vld [vmem:[%s4615_s4 + $0x250] sm:$0xff]  ;;  %v1885_v57 = vld [vmem:[%s4615_s4 + $0x268] sm:$0xff] }
  0x72   : > { %2600 = vmatmul.mubr.msk.f32.gmra.mrb[20].mxu0 %vm359_vm0, %v285_v58  ;;  %v1884_v58 = vld [vmem:[%s4615_s4 + $0x260] sm:$0xff] }
  0x73   : > { %526 = vmatprep.mubr.f32.mxu0 %v2990_v1 }
  0x75   : > { %708 = vperm.xlu1 %2871, %v606_v59   ;;  %703 = vperm.xlu0 %2870, %v605_v60   ;;  %v1887_v59 = vld [vmem:[%s4615_s4 + $0x278] sm:$0xff]  ;;  %v1886_v60 = vld [vmem:[%s4615_s4 + $0x270] sm:$0xff] }
  0x76   : > { %2601 = vmatmul.mubr.msk.f32.gmra.mrb[22].mxu0 %vm359_vm0, %v286_v61  ;;  %v1889_v61 = vld [vmem:[%s4615_s4 + $0x288] sm:$0xff] }
  0x77   : > { %942 = vmatprep.mubr.f32.mxu0 %v2990_v1 }
  0x79   : > { %718 = vperm.xlu1 %2871, %v608_v62   ;;  %713 = vperm.xlu0 %2870, %v607_v63   ;;  %v1888_v62 = vld [vmem:[%s4615_s4 + $0x280] sm:$0xff]  ;;  %v1891_v63 = vld [vmem:[%s4615_s4 + $0x298] sm:$0xff] }
  0x7d   : > { %728 = vperm.xlu1 %2871, %v610_v0   ;;  %723 = vperm.xlu0 %2870, %v609_v2   ;;  %v1890_v0 = vld [vmem:[%s4615_s4 + $0x290] sm:$0xff] }
  0x81   : > { %738 = vperm.xlu1 %2871, %v612_v3   ;;  %733 = vperm.xlu0 %2870, %v611_v4   ;;  %v1893_v4 = vld [vmem:[%s4615_s4 + $0x2a8] sm:$0xff] }
  0x85   : > { %748 = vperm.xlu1 %2871, %v614_v5   ;;  %743 = vperm.xlu0 %2870, %v613_v6   ;;  %v1892_v5 = vld [vmem:[%s4615_s4 + $0x2a0] sm:$0xff]  ;;  %v1895_v6 = vld [vmem:[%s4615_s4 + $0x2b8] sm:$0xff] }
  0x89   : > { %758 = vperm.xlu1 %2871, %v616_v7   ;;  %753 = vperm.xlu0 %2870, %v615_v8   ;;  %v1894_v8 = vld [vmem:[%s4615_s4 + $0x2b0] sm:$0xff] }
  0x8d   : > { %768 = vperm.xlu1 %2871, %v618_v9   ;;  %763 = vperm.xlu0 %2870, %v617_v10   ;;  %v1897_v10 = vld [vmem:[%s4615_s4 + $0x2c8] sm:$0xff] }
  0x91   : > { %778 = vperm.xlu1 %2871, %v620_v11   ;;  %773 = vperm.xlu0 %2870, %v619_v12   ;;  %v1896_v11 = vld [vmem:[%s4615_s4 + $0x2c0] sm:$0xff] }
  0x95   : > { %1270 = vperm.xlu1 %2871, %v1232_v13   ;;  %1265 = vperm.xlu0 %2870, %v1231_v14   ;;  %v1899_v14 = vld [vmem:[%s4615_s4 + $0x2d8] sm:$0xff] }
  0x99   : > { %1280 = vperm.xlu1 %2871, %v1234_v15   ;;  %1275 = vperm.xlu0 %2870, %v1233_v16   ;;  %v1898_v15 = vld [vmem:[%s4615_s4 + $0x2d0] sm:$0xff]  ;;  %v1901_v16 = vld [vmem:[%s4615_s4 + $0x2e8] sm:$0xff] }
  0x9d   : > { %1290 = vperm.xlu1 %2871, %v1236_v17   ;;  %1285 = vperm.xlu0 %2870, %v1235_v18   ;;  %v1900_v18 = vld [vmem:[%s4615_s4 + $0x2e0] sm:$0xff] }
  0xa1   : > { %1300 = vperm.xlu1 %2871, %v1238_v19   ;;  %1295 = vperm.xlu0 %2870, %v1237_v20   ;;  %v1903_v20 = vld [vmem:[%s4615_s4 + $0x2f8] sm:$0xff] }
  0xa5   : > { %1310 = vperm.xlu1 %2871, %v1240_v21   ;;  %1305 = vperm.xlu0 %2870, %v1239_v22   ;;  %v1902_v21 = vld [vmem:[%s4615_s4 + $0x2f0] sm:$0xff] }
  0xa9   : > { %1320 = vperm.xlu1 %2871, %v1242_v23   ;;  %1315 = vperm.xlu0 %2870, %v1241_v24  }
  0xad   : > { %1330 = vperm.xlu1 %2871, %v1244_v25   ;;  %1325 = vperm.xlu0 %2870, %v1243_v26  }
  0xb1   : > { %1340 = vperm.xlu1 %2871, %v1246_v27   ;;  %1335 = vperm.xlu0 %2870, %v1245_v28  }
  0xb5   : > { %1350 = vperm.xlu1 %2871, %v1248_v29   ;;  %1345 = vperm.xlu0 %2870, %v1247_v30  }
  0xb9   : > { %1360 = vperm.xlu1 %2871, %v1250_v31   ;;  %1355 = vperm.xlu0 %2870, %v1249_v32  }
  0xbc   : > { %v312_v2 = vpop.permute.xlu1 %311  ;;  %v302_v3 = vpop.permute.xlu0 %301 }
  0xbd   : > { %1370 = vperm.xlu1 %2871, %v1252_v33   ;;  %1365 = vperm.xlu0 %2870, %v1251_v34  }
  0xc0   : > { %v317_v7 = vpop.permute.xlu1 %316  ;;  %v307_v9 = vpop.permute.xlu0 %306 }
  0xc1   : > { %1380 = vperm.xlu1 %2871, %v1254_v35   ;;  %1375 = vperm.xlu0 %2870, %v1253_v36  }
  0xc4   : > { %v3526_v12 = vpop.permute.xlu1 %326  ;;  %v322_v13 = vpop.permute.xlu0 %321 }
  0xc5   : > { %1390 = vperm.xlu1 %2871, %v1256_v37   ;;  %1385 = vperm.xlu0 %2870, %v1255_v38  }
  0xc8   : > { %v3537_v17 = vpop.permute.xlu1 %336  ;;  %v332_v19 = vpop.permute.xlu0 %331 }
  0xc9   : > { %1400 = vperm.xlu1 %2871, %v1258_v39   ;;  %1395 = vperm.xlu0 %2870, %v1257_v40  }
  0xcc   : > { %v3548_v22 = vpop.permute.xlu1 %346  ;;  %v3550_v23 = vpop.permute.xlu0 %341 }
  0xcd   : > { %1410 = vperm.xlu1 %2871, %v1260_v41   ;;  %1405 = vperm.xlu0 %2870, %v1259_v42  }
  0xd1   : > { %1420 = vperm.xlu1 %2871, %v1262_v43   ;;  %1415 = vperm.xlu0 %2870, %v1261_v44  }
  0xd5   : > { %1911 = vperm.xlu1 %2871, %v1873_v45   ;;  %1906 = vperm.xlu0 %2870, %v1872_v46  }
  0xd9   : > { %1921 = vperm.xlu1 %2871, %v1875_v47   ;;  %1916 = vperm.xlu0 %2870, %v1874_v48  }
  0xdd   : > { %1931 = vperm.xlu1 %2871, %v1877_v49   ;;  %1926 = vperm.xlu0 %2870, %v1876_v50  }
  0xe1   : > { %1941 = vperm.xlu1 %2871, %v1879_v51   ;;  %1936 = vperm.xlu0 %2870, %v1878_v52  }
  0xe5   : > { %1951 = vperm.xlu1 %2871, %v1881_v53   ;;  %1946 = vperm.xlu0 %2870, %v1880_v54  }
  0xe9   : > { %1961 = vperm.xlu1 %2871, %v1883_v55   ;;  %1956 = vperm.xlu0 %2870, %v1882_v56  }
  0xed   : > { %1971 = vperm.xlu1 %2871, %v1885_v57   ;;  %1966 = vperm.xlu0 %2870, %v1884_v58  }
  0xf1   : > { %1981 = vperm.xlu1 %2871, %v1887_v59   ;;  %1976 = vperm.xlu0 %2870, %v1886_v60  }
  0xf5   : > { %1991 = vperm.xlu1 %2871, %v1889_v61   ;;  %1986 = vperm.xlu0 %2870, %v1888_v62  }
  0xf9   : > { %2001 = vperm.xlu1 %2871, %v1891_v63   ;;  %1996 = vperm.xlu0 %2870, %v1890_v0  }
  0xfd   : > { %2011 = vperm.xlu1 %2871, %v1893_v4   ;;  %2006 = vperm.xlu0 %2870, %v1892_v5  }
 0x101   : > { %2021 = vperm.xlu1 %2871, %v1895_v6   ;;  %2016 = vperm.xlu0 %2870, %v1894_v8  }
 0x105   : > { %2031 = vperm.xlu1 %2871, %v1897_v10   ;;  %2026 = vperm.xlu0 %2870, %v1896_v11  }
 0x109   : > { %2041 = vperm.xlu1 %2871, %v1899_v14   ;;  %2036 = vperm.xlu0 %2870, %v1898_v15  }
 0x10d   : > { %2051 = vperm.xlu1 %2871, %v1901_v16   ;;  %2046 = vperm.xlu0 %2870, %v1900_v18  }
 0x111   : > { %2061 = vperm.xlu1 %2871, %v1903_v20   ;;  %2056 = vperm.xlu0 %2870, %v1902_v21  }
 0x11d   : > { %v462_v24 = vpop.f32.mrb[0].mxu0 }
 0x11e   : > { %v464_v25 = vpop.f32.mrb[1].mxu0  ;;  %v463_v26 = vadd.f32 %v462_v24, %v302_v3 }
 0x11f   : > { %v465_v27 = vadd.f32 %v464_v25, %v302_v3 }
 0x120   : > { %v533_v32 = vmax.f32 %v463_v26, 0.0 }
 0x121   : > { %v468_v28 = vpop.f32.mrb[2].mxu0  ;;  %v534_v34 = vmax.f32 %v465_v27, 0.0 }
 0x122   : > { %v469_v29 = vadd.f32 %v468_v28, %v307_v9  ;;  %v470_v30 = vpop.f32.mrb[3].mxu0 }
 0x123   : > { %v471_v31 = vadd.f32 %v470_v30, %v307_v9 }
 0x124   : > { %v535_v33 = vmax.f32 %v469_v29, 0.0 }
 0x125   : > { %v536_v35 = vmax.f32 %v471_v31, 0.0  ;;  %v474_v36 = vpop.f32.mrb[4].mxu0 }
 0x126   : > { %v3552_v37 = vpack.c.bf16 %v535_v33, %v533_v32  ;;  %v476_v38 = vpop.f32.mrb[5].mxu0  ;;  %v475_v40 = vadd.f32 %v474_v36, %v312_v2  ;;  %v352_v33 = vpop.permute.xlu0 %351 }
 0x127   : > { %v3554_v39 = vpack.c.bf16 %v536_v35, %v534_v34  ;;  %v477_v41 = vadd.f32 %v476_v38, %v312_v2  ;;  %v357_v36 = vpop.permute.xlu1 %356 }
 0x128   : > { %v537_v46 = vmax.f32 %v475_v40, 0.0 }
 0x129   : > { %v480_v42 = vpop.f32.mrb[6].mxu0  ;;  %2714 = vmatprep.subr.bf16.mxu0 %v3554_v39  ;;  %2785 = vmatprep.subr.bf16.mxu1 %v3554_v39  ;;  %v538_v48 = vmax.f32 %v477_v41, 0.0 }
 0x12a   : > { %v481_v43 = vadd.f32 %v480_v42, %v317_v7  ;;  %v482_v44 = vpop.f32.mrb[7].mxu0  ;;  %2716 = vmatpush1.bf16.msra.mxu0 %v3552_v37  ;;  %2791 = vmatpush1.bf16.msra.mxu1 %v3552_v37 }
 0x12b   : > { %v483_v45 = vadd.f32 %v482_v44, %v317_v7 }
 0x12c   : > { %v539_v47 = vmax.f32 %v481_v43, 0.0 }
 0x12d   : > { %v540_v49 = vmax.f32 %v483_v45, 0.0  ;;  %v486_v50 = vpop.f32.mrb[8].mxu0 }
 0x12e   : > { %v3560_v51 = vpack.c.bf16 %v539_v47, %v537_v46  ;;  %v488_v52 = vpop.f32.mrb[9].mxu0  ;;  %v487_v54 = vadd.f32 %v486_v50, %v322_v13  ;;  %v568_v50 = vld [vmem:[%s4614_s3 + $0x58] sm:$0xff] }
 0x12f   : > { %v3562_v53 = vpack.c.bf16 %v540_v49, %v538_v48  ;;  %v489_v55 = vadd.f32 %v488_v52, %v322_v13  ;;  %v557_v49 = vld [vmem:[%s4614_s3] sm:$0xff]  ;;  %v558_v52 = vld [vmem:[%s4614_s3 + $0x8] sm:$0xff] }
 0x130   : > { %v541_v60 = vmax.f32 %v487_v54, 0.0  ;;  %v569_v54 = vld [vmem:[%s4614_s3 + $0x60] sm:$0xff] }
 0x131   : > { %v492_v56 = vpop.f32.mrb[10].mxu0  ;;  %2718 = vmatprep.subr.bf16.mxu0 %v3562_v53  ;;  %2786 = vmatprep.subr.bf16.mxu1 %v3562_v53  ;;  %v542_v62 = vmax.f32 %v489_v55, 0.0  ;;  %v561_v55 = vld [vmem:[%s4614_s3 + $0x20] sm:$0xff] }
 0x132   : > { %v493_v57 = vadd.f32 %v492_v56, %v3526_v12  ;;  %v494_v58 = vpop.f32.mrb[11].mxu0  ;;  %2720 = vmatpush1.bf16.msra.mxu0 %v3560_v51  ;;  %2792 = vmatpush1.bf16.msra.mxu1 %v3560_v51  ;;  %v572_v56 = vld [vmem:[%s4614_s3 + $0x78] sm:$0xff] }
 0x133   : > { %v495_v59 = vadd.f32 %v494_v58, %v3526_v12  ;;  %v573_v58 = vld [vmem:[%s4614_s3 + $0x80] sm:$0xff] }
 0x134   : > { %v543_v61 = vmax.f32 %v493_v57, 0.0  ;;  %v562_v57 = vld [vmem:[%s4614_s3 + $0x28] sm:$0xff] }
 0x135   : > { %v544_v63 = vmax.f32 %v495_v59, 0.0  ;;  %v498_v0 = vpop.f32.mrb[12].mxu0  ;;  %v563_v59 = vld [vmem:[%s4614_s3 + $0x30] sm:$0xff] }
 0x136   : > { %v3570_v2 = vpack.c.bf16 %v543_v61, %v541_v60  ;;  %v500_v3 = vpop.f32.mrb[13].mxu0  ;;  %v499_v5 = vadd.f32 %v498_v0, %v332_v19  ;;  %v574_v60 = vld [vmem:[%s4614_s3 + $0x88] sm:$0xff]  ;;  %v564_v61 = vld [vmem:[%s4614_s3 + $0x38] sm:$0xff] }
 0x137   : > { %v3572_v4 = vpack.c.bf16 %v544_v63, %v542_v62  ;;  %v501_v6 = vadd.f32 %v500_v3, %v332_v19  ;;  %v575_v62 = vld [vmem:[%s4614_s3 + $0x90] sm:$0xff]  ;;  %v565_v63 = vld [vmem:[%s4614_s3 + $0x40] sm:$0xff]  ;;  %v576_v0 = vld [vmem:[%s4614_s3 + $0x98] sm:$0xff] }
 0x138   : > { %v545_v11 = vmax.f32 %v499_v5, 0.0  ;;  %v577_v3 = vld [vmem:[%s4614_s3 + $0xa0] sm:$0xff]  ;;  %v578_v5 = vld [vmem:[%s4614_s3 + $0xa8] sm:$0xff] }
 0x139   : > { %v504_v7 = vpop.f32.mrb[14].mxu0  ;;  %2722 = vmatprep.subr.bf16.mxu0 %v3572_v4  ;;  %2787 = vmatprep.subr.bf16.mxu1 %v3572_v4  ;;  %v546_v13 = vmax.f32 %v501_v6, 0.0  ;;  %v579_v6 = vld [vmem:[%s4614_s3 + $0xb0] sm:$0xff] }
 0x13a   : > { %v505_v8 = vadd.f32 %v504_v7, %v3537_v17  ;;  %v506_v9 = vpop.f32.mrb[15].mxu0  ;;  %2724 = vmatpush1.bf16.msra.mxu0 %v3570_v2  ;;  %2793 = vmatpush1.bf16.msra.mxu1 %v3570_v2  ;;  %v1199_v7 = vld [vmem:[%s4614_s3 + $0x100] sm:$0xff] }
 0x13b   : > { %v507_v10 = vadd.f32 %v506_v9, %v3537_v17  ;;  %v1200_v9 = vld [vmem:[%s4614_s3 + $0x108] sm:$0xff] }
 0x13c   : > { %v547_v12 = vmax.f32 %v505_v8, 0.0  ;;  %v580_v8 = vld [vmem:[%s4614_s3 + $0xb8] sm:$0xff] }
 0x13d   : > { %v548_v14 = vmax.f32 %v507_v10, 0.0  ;;  %v510_v15 = vpop.f32.mrb[16].mxu0  ;;  %v581_v10 = vld [vmem:[%s4614_s3 + $0xc0] sm:$0xff] }
 0x13e   : > { %v3580_v16 = vpack.c.bf16 %v547_v12, %v545_v11  ;;  %v512_v18 = vpop.f32.mrb[17].mxu0  ;;  %v511_v20 = vadd.f32 %v510_v15, %v3550_v23  ;;  %v1201_v11 = vld [vmem:[%s4614_s3 + $0x110] sm:$0xff]  ;;  %v582_v12 = vld [vmem:[%s4614_s3 + $0xc8] sm:$0xff]  ;;  %v1203_v15 = vld [vmem:[%s4614_s3 + $0x120] sm:$0xff] }
 0x13f   : > { %v3582_v19 = vpack.c.bf16 %v548_v14, %v546_v13  ;;  %v513_v21 = vadd.f32 %v512_v18, %v3550_v23  ;;  %v1202_v13 = vld [vmem:[%s4614_s3 + $0x118] sm:$0xff]  ;;  %v583_v14 = vld [vmem:[%s4614_s3 + $0xd0] sm:$0xff]  ;;  %v1204_v18 = vld [vmem:[%s4614_s3 + $0x128] sm:$0xff] }
 0x140   : > { %v549_v27 = vmax.f32 %v511_v20, 0.0  ;;  %v1205_v20 = vld [vmem:[%s4614_s3 + $0x130] sm:$0xff] }
 0x141   : > { %v516_v24 = vpop.f32.mrb[18].mxu0  ;;  %2726 = vmatprep.subr.bf16.mxu0 %v3582_v19  ;;  %2788 = vmatprep.subr.bf16.mxu1 %v3582_v19  ;;  %v550_v29 = vmax.f32 %v513_v21, 0.0  ;;  %v586_v21 = vld [vmem:[%s4614_s3 + $0xe8] sm:$0xff] }
 0x142   : > { %v517_v17 = vadd.f32 %v516_v24, %v3548_v22  ;;  %v518_v25 = vpop.f32.mrb[19].mxu0  ;;  %2728 = vmatpush1.bf16.msra.mxu0 %v3580_v16  ;;  %2794 = vmatpush1.bf16.msra.mxu1 %v3580_v16  ;;  %v1206_v24 = vld [vmem:[%s4614_s3 + $0x138] sm:$0xff] }
 0x143   : > { %v519_v26 = vadd.f32 %v518_v25, %v3548_v22  ;;  %v1207_v25 = vld [vmem:[%s4614_s3 + $0x140] sm:$0xff] }
 0x144   : > { %v551_v28 = vmax.f32 %v517_v17, 0.0  ;;  %v587_v17 = vld [vmem:[%s4614_s3 + $0xf0] sm:$0xff] }
 0x145   : > { %v552_v30 = vmax.f32 %v519_v26, 0.0  ;;  %v522_v31 = vpop.f32.mrb[20].mxu0  ;;  %v588_v26 = vld [vmem:[%s4614_s3 + $0xf8] sm:$0xff] }
 0x146   : > { %v3592_v23 = vpack.c.bf16 %v551_v28, %v549_v27  ;;  %v524_v32 = vpop.f32.mrb[21].mxu0  ;;  %v523_v35 = vadd.f32 %v522_v31, %v352_v33  ;;  %v1208_v27 = vld [vmem:[%s4614_s3 + $0x148] sm:$0xff]  ;;  %v1209_v28 = vld [vmem:[%s4614_s3 + $0x150] sm:$0xff]  ;;  %v3844_v31 = vpop.permute.xlu1 %628 }
 0x147   : > { %v3594_v34 = vpack.c.bf16 %v552_v30, %v550_v29  ;;  %v525_v38 = vadd.f32 %v524_v32, %v352_v33  ;;  %v1840_v29 = vld [vmem:[%s4614_s3 + $0x200] sm:$0xff]  ;;  %v3842_v30 = vpop.permute.xlu0 %623  ;;  %v1841_v32 = vld [vmem:[%s4614_s3 + $0x208] sm:$0xff] }
 0x148   : > { %v553_v43 = vmax.f32 %v523_v35, 0.0  ;;  %v1842_v35 = vld [vmem:[%s4614_s3 + $0x210] sm:$0xff] }
 0x149   : > { %v528_v40 = vpop.f32.mrb[22].mxu0  ;;  %2730 = vmatprep.subr.bf16.mxu0 %v3594_v34  ;;  %2789 = vmatprep.subr.bf16.mxu1 %v3594_v34  ;;  %v554_v45 = vmax.f32 %v525_v38, 0.0  ;;  %v1212_v38 = vld [vmem:[%s4614_s3 + $0x168] sm:$0xff] }
 0x14a   : > { %v529_v22 = vadd.f32 %v528_v40, %v357_v36  ;;  %v530_v41 = vpop.f32.mrb[23].mxu0  ;;  %2732 = vmatpush1.bf16.msra.mxu0 %v3592_v23  ;;  %2795 = vmatpush1.bf16.msra.mxu1 %v3592_v23  ;;  %v1843_v40 = vld [vmem:[%s4614_s3 + $0x218] sm:$0xff] }
 0x14b   : > { %v531_v42 = vadd.f32 %v530_v41, %v357_v36  ;;  %v3856_v33 = vpop.permute.xlu0 %633  ;;  %v3868_v36 = vpop.permute.xlu1 %638 }
 0x14c   : > { %v555_v44 = vmax.f32 %v529_v22, 0.0 }
 0x14d   : > { %v556_v46 = vmax.f32 %v531_v42, 0.0  ;;  %v1213_v42 = vld [vmem:[%s4614_s3 + $0x170] sm:$0xff] }
 0x14e   : > { %v3600_v47 = vpack.c.bf16 %v555_v44, %v553_v43  ;;  %v1844_v43 = vld [vmem:[%s4614_s3 + $0x220] sm:$0xff] }
 0x14f   : > { %v2733_v48 = vpack.c.bf16 %v556_v46, %v554_v45  ;;  %v3880_v22 = vpop.permute.xlu0 %643  ;;  %v3882_v41 = vpop.permute.xlu1 %648  ;;  %v1214_v45 = vld [vmem:[%s4614_s3 + $0x178] sm:$0xff]  ;;  %v1845_v46 = vld [vmem:[%s4614_s3 + $0x228] sm:$0xff] }
 0x151   : > { %2734 = vmatprep.subr.bf16.mxu0 %v2733_v48  ;;  %2790 = vmatprep.subr.bf16.mxu1 %v2733_v48 }
 0x152   : > { %2736 = vmatpush1.bf16.msra.mxu0 %v3600_v47  ;;  %2796 = vmatpush1.bf16.msra.mxu1 %v3600_v47 }
 0x153   : > { %2738 = vmatprep.subr.bf16.mxu0 %v3554_v39  ;;  %2762 = vmatprep.subr.bf16.mxu1 %v3554_v39  ;;  %v570_v39 = vld [vmem:[%s4614_s3 + $0x68] sm:$0xff]  ;;  %v3894_v44 = vpop.permute.xlu0 %653 }
 0x155   : > { %2602 = vmatmul.mubr.msk.f32.vlgmr.msra.gmra.mrb[24].mxu0 %vm781_vm1, %v557_v49  ;;  %2613 = vmatmul.mubr.msk.f32.vlgmr.msra.gmra.mrb[0].mxu1 %vm781_vm1, %v568_v50  ;;  %v1846_v49 = vld [vmem:[%s4614_s3 + $0x230] sm:$0xff] }
 0x156   : > { %2740 = vmatpush1.bf16.msra.mxu0 %v3552_v37  ;;  %2764 = vmatpush1.bf16.msra.mxu1 %v3552_v37  ;;  %v559_v37 = vld [vmem:[%s4614_s3 + $0x10] sm:$0xff] }
 0x157   : > { %2742 = vmatprep.subr.bf16.mxu0 %v3562_v53  ;;  %2766 = vmatprep.subr.bf16.mxu1 %v3562_v53  ;;  %v571_v53 = vld [vmem:[%s4614_s3 + $0x70] sm:$0xff]  ;;  %v3918_v50 = vpop.permute.xlu0 %663 }
 0x158   : > { %948 = vmatprep.mubr.f32.mxu0 %v2990_v1  ;;  %1014 = vmatprep.mubr.f32.mxu1 %v2990_v1 }
 0x159   : > { %2603 = vmatmul.mubr.msk.f32.gmra.mrb[26].mxu0 %vm781_vm1, %v558_v52  ;;  %2614 = vmatmul.mubr.msk.f32.gmra.mrb[2].mxu1 %vm781_vm1, %v569_v54  ;;  %v1216_v54 = vld [vmem:[%s4614_s3 + $0x188] sm:$0xff] }
 0x15a   : > { %2744 = vmatpush1.bf16.msra.mxu0 %v3560_v51  ;;  %2768 = vmatpush1.bf16.msra.mxu1 %v3560_v51  ;;  %v560_v51 = vld [vmem:[%s4614_s3 + $0x18] sm:$0xff] }
 0x15b   : > { %2746 = vmatprep.subr.bf16.mxu0 %v3572_v4  ;;  %2770 = vmatprep.subr.bf16.mxu1 %v3572_v4  ;;  %v567_v4 = vld [vmem:[%s4614_s3 + $0x50] sm:$0xff] }
 0x15c   : > { %954 = vmatprep.mubr.f32.mxu0 %v2990_v1  ;;  %1020 = vmatprep.mubr.f32.mxu1 %v2990_v1 }
 0x15d   : > { %2604 = vmatmul.mubr.msk.f32.gmra.mrb[28].mxu0 %vm781_vm1, %v559_v37  ;;  %2615 = vmatmul.mubr.msk.f32.gmra.mrb[4].mxu1 %vm781_vm1, %v570_v39  ;;  %v1847_v37 = vld [vmem:[%s4614_s3 + $0x238] sm:$0xff]  ;;  %v3932_v39 = vpop.permute.xlu0 %673 }
 0x15e   : > { %2748 = vmatpush1.bf16.msra.mxu0 %v3570_v2  ;;  %2772 = vmatpush1.bf16.msra.mxu1 %v3570_v2  ;;  %v566_v2 = vld [vmem:[%s4614_s3 + $0x48] sm:$0xff] }
 0x15f   : > { %2750 = vmatprep.subr.bf16.mxu0 %v3582_v19  ;;  %2774 = vmatprep.subr.bf16.mxu1 %v3582_v19  ;;  %v585_v19 = vld [vmem:[%s4614_s3 + $0xe0] sm:$0xff] }
 0x160   : > { %960 = vmatprep.mubr.f32.mxu0 %v2990_v1  ;;  %1026 = vmatprep.mubr.f32.mxu1 %v2990_v1 }
 0x161   : > { %2605 = vmatmul.mubr.msk.f32.gmra.mrb[30].mxu0 %vm781_vm1, %v560_v51  ;;  %2616 = vmatmul.mubr.msk.f32.gmra.mrb[6].mxu1 %vm781_vm1, %v571_v53  ;;  %v1217_v51 = vld [vmem:[%s4614_s3 + $0x190] sm:$0xff]  ;;  %v1848_v53 = vld [vmem:[%s4614_s3 + $0x240] sm:$0xff] }
 0x162   : > { %2752 = vmatpush1.bf16.msra.mxu0 %v3580_v16  ;;  %2776 = vmatpush1.bf16.msra.mxu1 %v3580_v16  ;;  %v584_v16 = vld [vmem:[%s4614_s3 + $0xd8] sm:$0xff] }
 0x163   : > { %2754 = vmatprep.subr.bf16.mxu0 %v3594_v34  ;;  %2778 = vmatprep.subr.bf16.mxu1 %v3594_v34  ;;  %v1211_v34 = vld [vmem:[%s4614_s3 + $0x160] sm:$0xff] }
 0x164   : > { %966 = vmatprep.mubr.f32.mxu0 %v2990_v1  ;;  %1032 = vmatprep.mubr.f32.mxu1 %v2990_v1 }
 0x165   : > { %2606 = vmatmul.mubr.msk.f32.gmra.mrb[32].mxu0 %vm781_vm1, %v561_v55  ;;  %2617 = vmatmul.mubr.msk.f32.gmra.mrb[8].mxu1 %vm781_vm1, %v572_v56  ;;  %v1218_v56 = vld [vmem:[%s4614_s3 + $0x198] sm:$0xff] }
 0x166   : > { %2756 = vmatpush1.bf16.msra.mxu0 %v3592_v23  ;;  %2780 = vmatpush1.bf16.msra.mxu1 %v3592_v23  ;;  %v1210_v23 = vld [vmem:[%s4614_s3 + $0x158] sm:$0xff] }
 0x167   : > { %2758 = vmatprep.subr.bf16.mxu0 %v2733_v48  ;;  %2782 = vmatprep.subr.bf16.mxu1 %v2733_v48  ;;  %v1215_v48 = vld [vmem:[%s4614_s3 + $0x180] sm:$0xff] }
 0x168   : > { %972 = vmatprep.mubr.f32.mxu0 %v2990_v1  ;;  %1038 = vmatprep.mubr.f32.mxu1 %v2990_v1 }
 0x169   : > { %2607 = vmatmul.mubr.msk.f32.gmra.mrb[34].mxu0 %vm781_vm1, %v562_v57  ;;  %2618 = vmatmul.mubr.msk.f32.gmra.mrb[10].mxu1 %vm781_vm1, %v573_v58  ;;  %v1849_v57 = vld [vmem:[%s4614_s3 + $0x248] sm:$0xff]  ;;  %v3956_v58 = vpop.permute.xlu0 %683 }
 0x16a   : > { %2760 = vmatpush1.bf16.msra.mxu0 %v3600_v47  ;;  %2784 = vmatpush1.bf16.msra.mxu1 %v3600_v47  ;;  %v3906_v47 = vpop.permute.xlu1 %658 }
 0x16b   : > { %978 = vmatprep.mubr.f32.mxu0 %v2990_v1  ;;  %1044 = vmatprep.mubr.f32.mxu1 %v2990_v1 }
 0x16d   : > { %2608 = vmatmul.mubr.msk.f32.gmra.mrb[36].mxu0 %vm781_vm1, %v563_v59  ;;  %2619 = vmatmul.mubr.msk.f32.gmra.mrb[12].mxu1 %vm781_vm1, %v574_v60  ;;  %v1219_v60 = vld [vmem:[%s4614_s3 + $0x1a0] sm:$0xff] }
 0x16e   : > { %984 = vmatprep.mubr.f32.mxu0 %v2990_v1  ;;  %1050 = vmatprep.mubr.f32.mxu1 %v2990_v1  ;;  %v3920_v52 = vpop.permute.xlu1 %668 }
 0x171   : > { %2609 = vmatmul.mubr.msk.f32.gmra.mrb[38].mxu0 %vm781_vm1, %v564_v61  ;;  %2620 = vmatmul.mubr.msk.f32.gmra.mrb[14].mxu1 %vm781_vm1, %v575_v62  ;;  %v1850_v61 = vld [vmem:[%s4614_s3 + $0x250] sm:$0xff]  ;;  %v3970_v62 = vpop.permute.xlu0 %693 }
 0x172   : > { %990 = vmatprep.mubr.f32.mxu0 %v2990_v1  ;;  %1056 = vmatprep.mubr.f32.mxu1 %v2990_v1  ;;  %v3944_v55 = vpop.permute.xlu1 %678 }
 0x175   : > { %2610 = vmatmul.mubr.msk.f32.gmra.mrb[40].mxu0 %vm781_vm1, %v565_v63  ;;  %2621 = vmatmul.mubr.msk.f32.gmra.mrb[16].mxu1 %vm781_vm1, %v576_v0  ;;  %v1220_v63 = vld [vmem:[%s4614_s3 + $0x1a8] sm:$0xff]  ;;  %v1851_v0 = vld [vmem:[%s4614_s3 + $0x258] sm:$0xff] }
 0x176   : > { %996 = vmatprep.mubr.f32.mxu0 %v2990_v1  ;;  %1062 = vmatprep.mubr.f32.mxu1 %v2990_v1  ;;  %v3958_v59 = vpop.permute.xlu1 %688 }
 0x179   : > { %2611 = vmatmul.mubr.msk.f32.gmra.mrb[42].mxu0 %vm781_vm1, %v566_v2  ;;  %2622 = vmatmul.mubr.msk.f32.gmra.mrb[18].mxu1 %vm781_vm1, %v577_v3  ;;  %v1221_v3 = vld [vmem:[%s4614_s3 + $0x1b0] sm:$0xff] }
 0x17a   : > { %1002 = vmatprep.mubr.f32.mxu0 %v2990_v1  ;;  %1068 = vmatprep.mubr.f32.mxu1 %v2990_v1  ;;  %v3982_v2 = vpop.permute.xlu1 %698 }
 0x17d   : > { %2612 = vmatmul.mubr.msk.f32.gmra.mrb[44].mxu0 %vm781_vm1, %v567_v4  ;;  %2623 = vmatmul.mubr.msk.f32.gmra.mrb[20].mxu1 %vm781_vm1, %v578_v5  ;;  %v1852_v4 = vld [vmem:[%s4614_s3 + $0x260] sm:$0xff]  ;;  %v3994_v5 = vpop.permute.xlu0 %703 }
 0x17e   : > { %1074 = vmatprep.mubr.f32.mxu1 %v2990_v1  ;;  %1583 = vmatprep.mubr.f32.mxu0 %v2990_v1 }
 0x181   : > { %2624 = vmatmul.mubr.msk.f32.gmra.mrb[22].mxu1 %vm781_vm1, %v579_v6  ;;  %2634 = vmatmul.mubr.msk.f32.vlgmr.msra.gmra.mrb[46].mxu0 %vm781_vm1, %v1199_v7  ;;  %v3996_v6 = vpop.permute.xlu1 %708  ;;  %v1222_v7 = vld [vmem:[%s4614_s3 + $0x1b8] sm:$0xff] }
 0x182   : > { %1080 = vmatprep.mubr.f32.mxu1 %v2990_v1  ;;  %1589 = vmatprep.mubr.f32.mxu0 %v2990_v1 }
 0x185   : > { %2625 = vmatmul.mubr.msk.f32.gmra.mrb[24].mxu1 %vm781_vm1, %v580_v8  ;;  %2635 = vmatmul.mubr.msk.f32.gmra.mrb[48].mxu0 %vm781_vm1, %v1200_v9  ;;  %v1853_v8 = vld [vmem:[%s4614_s3 + $0x268] sm:$0xff]  ;;  %v4008_v9 = vpop.permute.xlu0 %713 }
 0x186   : > { %1086 = vmatprep.mubr.f32.mxu1 %v2990_v1  ;;  %1595 = vmatprep.mubr.f32.mxu0 %v2990_v1 }
 0x189   : > { %2626 = vmatmul.mubr.msk.f32.gmra.mrb[26].mxu1 %vm781_vm1, %v581_v10  ;;  %2636 = vmatmul.mubr.msk.f32.gmra.mrb[50].mxu0 %vm781_vm1, %v1201_v11  ;;  %v1223_v10 = vld [vmem:[%s4614_s3 + $0x1c0] sm:$0xff]  ;;  %v1854_v11 = vld [vmem:[%s4614_s3 + $0x270] sm:$0xff] }
 0x18a   : > { %1092 = vmatprep.mubr.f32.mxu1 %v2990_v1  ;;  %1601 = vmatprep.mubr.f32.mxu0 %v2990_v1 }
 0x18d   : > { %2627 = vmatmul.mubr.msk.f32.gmra.mrb[28].mxu1 %vm781_vm1, %v582_v12  ;;  %2637 = vmatmul.mubr.msk.f32.gmra.mrb[52].mxu0 %vm781_vm1, %v1202_v13  ;;  %v4020_v12 = vpop.permute.xlu1 %718  ;;  %v1224_v13 = vld [vmem:[%s4614_s3 + $0x1c8] sm:$0xff] }
 0x18e   : > { %1098 = vmatprep.mubr.f32.mxu1 %v2990_v1  ;;  %1607 = vmatprep.mubr.f32.mxu0 %v2990_v1 }
 0x191   : > { %2628 = vmatmul.mubr.msk.f32.gmra.mrb[30].mxu1 %vm781_vm1, %v583_v14  ;;  %2638 = vmatmul.mubr.msk.f32.gmra.mrb[54].mxu0 %vm781_vm1, %v1203_v15  ;;  %v1855_v14 = vld [vmem:[%s4614_s3 + $0x278] sm:$0xff]  ;;  %v4032_v15 = vpop.permute.xlu0 %723 }
 0x192   : > { %1104 = vmatprep.mubr.f32.mxu1 %v2990_v1  ;;  %1613 = vmatprep.mubr.f32.mxu0 %v2990_v1 }
 0x195   : > { %2629 = vmatmul.mubr.msk.f32.gmra.mrb[32].mxu1 %vm781_vm1, %v584_v16  ;;  %2639 = vmatmul.mubr.msk.f32.gmra.mrb[56].mxu0 %vm781_vm1, %v1204_v18  ;;  %v4034_v16 = vpop.permute.xlu1 %728  ;;  %v1225_v18 = vld [vmem:[%s4614_s3 + $0x1d0] sm:$0xff] }
 0x196   : > { %1110 = vmatprep.mubr.f32.mxu1 %v2990_v1  ;;  %1619 = vmatprep.mubr.f32.mxu0 %v2990_v1 }
 0x199   : > { %2630 = vmatmul.mubr.msk.f32.gmra.mrb[34].mxu1 %vm781_vm1, %v585_v19  ;;  %2640 = vmatmul.mubr.msk.f32.gmra.mrb[58].mxu0 %vm781_vm1, %v1205_v20  ;;  %v1856_v19 = vld [vmem:[%s4614_s3 + $0x280] sm:$0xff]  ;;  %v4046_v20 = vpop.permute.xlu0 %733 }
 0x19a   : > { %1116 = vmatprep.mubr.f32.mxu1 %v2990_v1  ;;  %1625 = vmatprep.mubr.f32.mxu0 %v2990_v1 }
 0x19d   : > { %2631 = vmatmul.mubr.msk.f32.gmra.mrb[36].mxu1 %vm781_vm1, %v586_v21  ;;  %2641 = vmatmul.mubr.msk.f32.gmra.mrb[60].mxu0 %vm781_vm1, %v1206_v24  ;;  %v1226_v21 = vld [vmem:[%s4614_s3 + $0x1d8] sm:$0xff]  ;;  %v1857_v24 = vld [vmem:[%s4614_s3 + $0x288] sm:$0xff] }
 0x19e   : > { %1122 = vmatprep.mubr.f32.mxu1 %v2990_v1  ;;  %1631 = vmatprep.mubr.f32.mxu0 %v2990_v1 }
 0x1a1   : > { %2632 = vmatmul.mubr.msk.f32.gmra.mrb[38].mxu1 %vm781_vm1, %v587_v17  ;;  %2642 = vmatmul.mubr.msk.f32.gmra.mrb[62].mxu0 %vm781_vm1, %v1207_v25  ;;  %v4058_v17 = vpop.permute.xlu1 %738  ;;  %v1227_v25 = vld [vmem:[%s4614_s3 + $0x1e0] sm:$0xff] }
 0x1a2   : > { %1128 = vmatprep.mubr.f32.mxu1 %v2990_v1  ;;  %1637 = vmatprep.mubr.f32.mxu0 %v2990_v1 }
 0x1a5   : > { %2633 = vmatmul.mubr.msk.f32.gmra.mrb[40].mxu1 %vm781_vm1, %v588_v26  ;;  %2643 = vmatmul.mubr.msk.f32.gmra.mrb[64].mxu0 %vm781_vm1, %v1208_v27  ;;  %v1858_v26 = vld [vmem:[%s4614_s3 + $0x290] sm:$0xff]  ;;  %v4070_v27 = vpop.permute.xlu0 %743 }
 0x1a6   : > { %1643 = vmatprep.mubr.f32.mxu0 %v2990_v1  ;;  %2224 = vmatprep.mubr.f32.mxu1 %v2990_v1 }
 0x1a9   : > { %2644 = vmatmul.mubr.msk.f32.gmra.mrb[66].mxu0 %vm781_vm1, %v1209_v28  ;;  %2666 = vmatmul.mubr.msk.f32.vlgmr.msra.gmra.mrb[42].mxu1 %vm781_vm1, %v1840_v29  ;;  %v4072_v28 = vpop.permute.xlu1 %748  ;;  %v1228_v29 = vld [vmem:[%s4614_s3 + $0x1e8] sm:$0xff] }
 0x1aa   : > { %1649 = vmatprep.mubr.f32.mxu0 %v2990_v1  ;;  %2230 = vmatprep.mubr.f32.mxu1 %v2990_v1 }
 0x1ad   : > { %2645 = vmatmul.mubr.msk.f32.gmra.mrb[68].mxu0 %vm781_vm1, %v1210_v23  ;;  %2667 = vmatmul.mubr.msk.f32.gmra.mrb[44].mxu1 %vm781_vm1, %v1841_v32  ;;  %v1859_v23 = vld [vmem:[%s4614_s3 + $0x298] sm:$0xff]  ;;  %v4084_v32 = vpop.permute.xlu0 %753 }
 0x1ae   : > { %1655 = vmatprep.mubr.f32.mxu0 %v2990_v1  ;;  %2236 = vmatprep.mubr.f32.mxu1 %v2990_v1 }
 0x1b1   : > { %2646 = vmatmul.mubr.msk.f32.gmra.mrb[70].mxu0 %vm781_vm1, %v1211_v34  ;;  %2668 = vmatmul.mubr.msk.f32.gmra.mrb[46].mxu1 %vm781_vm1, %v1842_v35  ;;  %v1229_v34 = vld [vmem:[%s4614_s3 + $0x1f0] sm:$0xff]  ;;  %v1860_v35 = vld [vmem:[%s4614_s3 + $0x2a0] sm:$0xff] }
 0x1b2   : > { %1661 = vmatprep.mubr.f32.mxu0 %v2990_v1  ;;  %2242 = vmatprep.mubr.f32.mxu1 %v2990_v1 }
 0x1b5   : > { %2647 = vmatmul.mubr.msk.f32.gmra.mrb[72].mxu0 %vm781_vm1, %v1212_v38  ;;  %2669 = vmatmul.mubr.msk.f32.gmra.mrb[48].mxu1 %vm781_vm1, %v1843_v40  ;;  %v4096_v38 = vpop.permute.xlu1 %758  ;;  %v1230_v40 = vld [vmem:[%s4614_s3 + $0x1f8] sm:$0xff] }
 0x1b6   : > { %1667 = vmatprep.mubr.f32.mxu0 %v2990_v1  ;;  %2248 = vmatprep.mubr.f32.mxu1 %v2990_v1 }
 0x1b9   : > { %2648 = vmatmul.mubr.msk.f32.gmra.mrb[74].mxu0 %vm781_vm1, %v1213_v42  ;;  %2670 = vmatmul.mubr.msk.f32.gmra.mrb[50].mxu1 %vm781_vm1, %v1844_v43  ;;  %v1861_v42 = vld [vmem:[%s4614_s3 + $0x2a8] sm:$0xff]  ;;  %v4108_v43 = vpop.permute.xlu0 %763 }
 0x1ba   : > { %1673 = vmatprep.mubr.f32.mxu0 %v2990_v1  ;;  %2254 = vmatprep.mubr.f32.mxu1 %v2990_v1 }
 0x1bd   : > { %2649 = vmatmul.mubr.msk.f32.gmra.mrb[76].mxu0 %vm781_vm1, %v1214_v45  ;;  %2671 = vmatmul.mubr.msk.f32.gmra.mrb[52].mxu1 %vm781_vm1, %v1845_v46  ;;  %v4110_v45 = vpop.permute.xlu1 %768  ;;  %v1862_v46 = vld [vmem:[%s4614_s3 + $0x2b0] sm:$0xff] }
 0x1be   : > { %1679 = vmatprep.mubr.f32.mxu0 %v2990_v1  ;;  %2260 = vmatprep.mubr.f32.mxu1 %v2990_v1 }
 0x1c1   : > { %2650 = vmatmul.mubr.msk.f32.gmra.mrb[78].mxu0 %vm781_vm1, %v1215_v48  ;;  %2672 = vmatmul.mubr.msk.f32.gmra.mrb[54].mxu1 %vm781_vm1, %v1846_v49  ;;  %v4118_v48 = vpop.permute.xlu0 %773  ;;  %v1863_v49 = vld [vmem:[%s4614_s3 + $0x2b8] sm:$0xff] }
 0x1c2   : > { %1685 = vmatprep.mubr.f32.mxu0 %v2990_v1  ;;  %2266 = vmatprep.mubr.f32.mxu1 %v2990_v1 }
 0x1c5   : > { %2651 = vmatmul.mubr.msk.f32.gmra.mrb[80].mxu0 %vm781_vm1, %v1216_v54  ;;  %2673 = vmatmul.mubr.msk.f32.gmra.mrb[56].mxu1 %vm781_vm1, %v1847_v37  ;;  %v4125_v54 = vpop.permute.xlu1 %778  ;;  %v1864_v37 = vld [vmem:[%s4614_s3 + $0x2c0] sm:$0xff] }
 0x1c6   : > { %1691 = vmatprep.mubr.f32.mxu0 %v2990_v1  ;;  %2272 = vmatprep.mubr.f32.mxu1 %v2990_v1 }
 0x1c9   : > { %2652 = vmatmul.mubr.msk.f32.gmra.mrb[82].mxu0 %vm781_vm1, %v1217_v51  ;;  %2674 = vmatmul.mubr.msk.f32.gmra.mrb[58].mxu1 %vm781_vm1, %v1848_v53  ;;  %v4132_v51 = vpop.permute.xlu0 %1265  ;;  %v4134_v53 = vpop.permute.xlu1 %1270 }
 0x1ca   : > { %1697 = vmatprep.mubr.f32.mxu0 %v2990_v1  ;;  %2278 = vmatprep.mubr.f32.mxu1 %v2990_v1 }
 0x1cd   : > { %2653 = vmatmul.mubr.msk.f32.gmra.mrb[84].mxu0 %vm781_vm1, %v1218_v56  ;;  %2675 = vmatmul.mubr.msk.f32.gmra.mrb[60].mxu1 %vm781_vm1, %v1849_v57  ;;  %v1865_v56 = vld [vmem:[%s4614_s3 + $0x2c8] sm:$0xff]  ;;  %v4141_v57 = vpop.permute.xlu0 %1275 }
 0x1ce   : > { %1703 = vmatprep.mubr.f32.mxu0 %v2990_v1  ;;  %2284 = vmatprep.mubr.f32.mxu1 %v2990_v1 }
 0x1d1   : > { %2654 = vmatmul.mubr.msk.f32.gmra.mrb[86].mxu0 %vm781_vm1, %v1219_v60  ;;  %2676 = vmatmul.mubr.msk.f32.gmra.mrb[62].mxu1 %vm781_vm1, %v1850_v61  ;;  %v1866_v60 = vld [vmem:[%s4614_s3 + $0x2d0] sm:$0xff]  ;;  %v4148_v61 = vpop.permute.xlu1 %1280 }
 0x1d2   : > { %1709 = vmatprep.mubr.f32.mxu0 %v2990_v1  ;;  %2290 = vmatprep.mubr.f32.mxu1 %v2990_v1 }
 0x1d5   : > { %2655 = vmatmul.mubr.msk.f32.gmra.mrb[88].mxu0 %vm781_vm1, %v1220_v63  ;;  %2677 = vmatmul.mubr.msk.f32.gmra.mrb[64].mxu1 %vm781_vm1, %v1851_v0  ;;  %v1867_v63 = vld [vmem:[%s4614_s3 + $0x2d8] sm:$0xff]  ;;  %v4155_v0 = vpop.permute.xlu0 %1285 }
 0x1d6   : > { %1715 = vmatprep.mubr.f32.mxu0 %v2990_v1  ;;  %2296 = vmatprep.mubr.f32.mxu1 %v2990_v1 }
 0x1d9   : > { %2656 = vmatmul.mubr.msk.f32.gmra.mrb[90].mxu0 %vm781_vm1, %v1221_v3  ;;  %2678 = vmatmul.mubr.msk.f32.gmra.mrb[66].mxu1 %vm781_vm1, %v1852_v4  ;;  %v4157_v3 = vpop.permute.xlu1 %1290  ;;  %v1868_v4 = vld [vmem:[%s4614_s3 + $0x2e0] sm:$0xff] }
 0x1da   : > { %1721 = vmatprep.mubr.f32.mxu0 %v2990_v1  ;;  %2302 = vmatprep.mubr.f32.mxu1 %v2990_v1 }
 0x1dd   : > { %2657 = vmatmul.mubr.msk.f32.gmra.mrb[92].mxu0 %vm781_vm1, %v1222_v7  ;;  %2679 = vmatmul.mubr.msk.f32.gmra.mrb[68].mxu1 %vm781_vm1, %v1853_v8  ;;  %v4164_v7 = vpop.permute.xlu0 %1295  ;;  %v1869_v8 = vld [vmem:[%s4614_s3 + $0x2e8] sm:$0xff] }
 0x1de   : > { %1727 = vmatprep.mubr.f32.mxu0 %v2990_v1  ;;  %2308 = vmatprep.mubr.f32.mxu1 %v2990_v1 }
 0x1e1   : > { %2658 = vmatmul.mubr.msk.f32.gmra.mrb[94].mxu0 %vm781_vm1, %v1223_v10  ;;  %2680 = vmatmul.mubr.msk.f32.gmra.mrb[70].mxu1 %vm781_vm1, %v1854_v11  ;;  %v4171_v10 = vpop.permute.xlu1 %1300  ;;  %v1870_v11 = vld [vmem:[%s4614_s3 + $0x2f0] sm:$0xff] }
 0x1e2   : > { %1733 = vmatprep.mubr.f32.mxu0 %v2990_v1  ;;  %2314 = vmatprep.mubr.f32.mxu1 %v2990_v1 }
 0x1e5   : > { %2659 = vmatmul.mubr.msk.f32.gmra.mrb[96].mxu0 %vm781_vm1, %v1224_v13  ;;  %2681 = vmatmul.mubr.msk.f32.gmra.mrb[72].mxu1 %vm781_vm1, %v1855_v14  ;;  %v4178_v13 = vpop.permute.xlu0 %1305  ;;  %v4180_v14 = vpop.permute.xlu1 %1310 }
 0x1e6   : > { %1739 = vmatprep.mubr.f32.mxu0 %v2990_v1  ;;  %2320 = vmatprep.mubr.f32.mxu1 %v2990_v1 }
 0x1e9   : > { %2660 = vmatmul.mubr.msk.f32.gmra.mrb[98].mxu0 %vm781_vm1, %v1225_v18  ;;  %2682 = vmatmul.mubr.msk.f32.gmra.mrb[74].mxu1 %vm781_vm1, %v1856_v19  ;;  %v1871_v18 = vld [vmem:[%s4614_s3 + $0x2f8] sm:$0xff]  ;;  %v4188_v19 = vpop.permute.xlu0 %1315 }
 0x1ea   : > { %1745 = vmatprep.mubr.f32.mxu0 %v2990_v1  ;;  %2326 = vmatprep.mubr.f32.mxu1 %v2990_v1 }
 0x1ed   : > { %2661 = vmatmul.mubr.msk.f32.gmra.mrb[100].mxu0 %vm781_vm1, %v1226_v21  ;;  %2683 = vmatmul.mubr.msk.f32.gmra.mrb[76].mxu1 %vm781_vm1, %v1857_v24  ;;  %v4191_v21 = vpop.permute.xlu1 %1320 }
 0x1ee   : > { %1751 = vmatprep.mubr.f32.mxu0 %v2990_v1  ;;  %2332 = vmatprep.mubr.f32.mxu1 %v2990_v1 }
 0x1f1   : > { %2662 = vmatmul.mubr.msk.f32.gmra.mrb[102].mxu0 %vm781_vm1, %v1227_v25  ;;  %2684 = vmatmul.mubr.msk.f32.gmra.mrb[78].mxu1 %vm781_vm1, %v1858_v26 }
 0x1f2   : > { %1757 = vmatprep.mubr.f32.mxu0 %v2990_v1  ;;  %2338 = vmatprep.mubr.f32.mxu1 %v2990_v1 }
 0x1f5   : > { %2663 = vmatmul.mubr.msk.f32.gmra.mrb[104].mxu0 %vm781_vm1, %v1228_v29  ;;  %2685 = vmatmul.mubr.msk.f32.gmra.mrb[80].mxu1 %vm781_vm1, %v1859_v23 }
 0x1f6   : > { %1763 = vmatprep.mubr.f32.mxu0 %v2990_v1  ;;  %2344 = vmatprep.mubr.f32.mxu1 %v2990_v1 }
 0x1f9   : > { %2664 = vmatmul.mubr.msk.f32.gmra.mrb[106].mxu0 %vm781_vm1, %v1229_v34  ;;  %2686 = vmatmul.mubr.msk.f32.gmra.mrb[82].mxu1 %vm781_vm1, %v1860_v35 }
 0x1fa   : > { %1769 = vmatprep.mubr.f32.mxu0 %v2990_v1  ;;  %2350 = vmatprep.mubr.f32.mxu1 %v2990_v1 }
 0x1fd   : > { %2665 = vmatmul.mubr.msk.f32.gmra.mrb[108].mxu0 %vm781_vm1, %v1230_v40  ;;  %2687 = vmatmul.mubr.msk.f32.gmra.mrb[84].mxu1 %vm781_vm1, %v1861_v42  ;;  %v4197_v40 = vpop.permute.xlu0 %1325 }
 0x1fe   : > { %2356 = vmatprep.mubr.f32.mxu1 %v2990_v1 }
 0x201   : > { %2688 = vmatmul.mubr.msk.f32.gmra.mrb[86].mxu1 %vm781_vm1, %v1862_v46 }
 0x202   : > { %2362 = vmatprep.mubr.f32.mxu1 %v2990_v1 }
 0x205   : > { %2689 = vmatmul.mubr.msk.f32.gmra.mrb[88].mxu1 %vm781_vm1, %v1863_v49 }
 0x206   : > { %2368 = vmatprep.mubr.f32.mxu1 %v2990_v1 }
 0x209   : > { %2690 = vmatmul.mubr.msk.f32.gmra.mrb[90].mxu1 %vm781_vm1, %v1864_v37 }
 0x20a   : > { %2374 = vmatprep.mubr.f32.mxu1 %v2990_v1 }
 0x20d   : > { %2691 = vmatmul.mubr.msk.f32.gmra.mrb[92].mxu1 %vm781_vm1, %v1865_v56 }
 0x20e   : > { %2380 = vmatprep.mubr.f32.mxu1 %v2990_v1 }
 0x211   : > { %2692 = vmatmul.mubr.msk.f32.gmra.mrb[94].mxu1 %vm781_vm1, %v1866_v60 }
 0x212   : > { %2386 = vmatprep.mubr.f32.mxu1 %v2990_v1 }
 0x215   : > { %2693 = vmatmul.mubr.msk.f32.gmra.mrb[96].mxu1 %vm781_vm1, %v1867_v63  ;;  %v4209_v63 = vpop.permute.xlu1 %1330 }
 0x216   : > { %2392 = vmatprep.mubr.f32.mxu1 %v2990_v1 }
 0x219   : > { %2694 = vmatmul.mubr.msk.f32.gmra.mrb[98].mxu1 %vm781_vm1, %v1868_v4 }
 0x21a   : > { %2398 = vmatprep.mubr.f32.mxu1 %v2990_v1 }
 0x21d   : > { %2695 = vmatmul.mubr.msk.f32.gmra.mrb[100].mxu1 %vm781_vm1, %v1869_v8 }
 0x21e   : > { %2404 = vmatprep.mubr.f32.mxu1 %v2990_v1 }
 0x221   : > { %2696 = vmatmul.mubr.msk.f32.gmra.mrb[102].mxu1 %vm781_vm1, %v1870_v11 }
 0x222   : > { %2410 = vmatprep.mubr.f32.mxu1 %v2990_v1 }
 0x225   : > { %2697 = vmatmul.mubr.msk.f32.gmra.mrb[104].mxu1 %vm781_vm1, %v1871_v18 }
 0x228   : > { %v944_v24 = vpop.f32.mrb[24].mxu0  ;;  %v1010_v25 = vpop.f32.mrb[0].mxu1 }
 0x229   : > { %v945_v26 = vadd.f32 %v944_v24, %v3842_v30  ;;  %v1011_v29 = vadd.f32 %v1010_v25, %v3944_v55  ;;  %v946_v23 = vpop.f32.mrb[25].mxu0  ;;  %v1012_v34 = vpop.f32.mrb[1].mxu1 }
 0x22a   : > { %v947_v1 = vadd.f32 %v946_v23, %v3842_v30  ;;  %v1013_v35 = vadd.f32 %v1012_v34, %v3944_v55 }
 0x22b   : > { %1135 = vst [vmem:[%s4199_s12] sm:$0xff] %v945_v26  ;;  %1157 = vst [vmem:[%s4199_s12 + $0xb0] sm:$0xff] %v1011_v29  ;;  %v4219_v26 = vpop.permute.xlu0 %1335 }
 0x22c   : > { %1136 = vst [vmem:[%s4199_s12 + $0x8] sm:$0xff] %v947_v1  ;;  %1158 = vst [vmem:[%s4199_s12 + $0xb8] sm:$0xff] %v1013_v35  ;;  %v950_v42 = vpop.f32.mrb[26].mxu0  ;;  %v1016_v30 = vpop.f32.mrb[2].mxu1 }
 0x22d   : > { %v951_v55 = vadd.f32 %v950_v42, %v3844_v31  ;;  %v1017_v46 = vadd.f32 %v1016_v30, %v3956_v58  ;;  %v952_v49 = vpop.f32.mrb[27].mxu0  ;;  %v1018_v37 = vpop.f32.mrb[3].mxu1 }
 0x22e   : > { %v953_v56 = vadd.f32 %v952_v49, %v3844_v31  ;;  %v1019_v60 = vadd.f32 %v1018_v37, %v3956_v58  ;;  %v4229_v30 = vpop.permute.xlu1 %1340 }
 0x22f   : > { %1137 = vst [vmem:[%s4199_s12 + $0x10] sm:$0xff] %v951_v55  ;;  %1159 = vst [vmem:[%s4199_s12 + $0xc0] sm:$0xff] %v1017_v46 }
 0x230   : > { %1138 = vst [vmem:[%s4199_s12 + $0x18] sm:$0xff] %v953_v56  ;;  %1160 = vst [vmem:[%s4199_s12 + $0xc8] sm:$0xff] %v1019_v60  ;;  %v956_v4 = vpop.f32.mrb[28].mxu0  ;;  %v1022_v8 = vpop.f32.mrb[4].mxu1 }
 0x231   : > { %v957_v11 = vadd.f32 %v956_v4, %v3856_v33  ;;  %v1023_v18 = vadd.f32 %v1022_v8, %v3958_v59  ;;  %v958_v24 = vpop.f32.mrb[29].mxu0  ;;  %v1024_v31 = vpop.f32.mrb[5].mxu1 }
 0x232   : > { %v959_v25 = vadd.f32 %v958_v24, %v3856_v33  ;;  %v1025_v58 = vadd.f32 %v1024_v31, %v3958_v59  ;;  %v4239_v4 = vpop.permute.xlu0 %1345 }
 0x233   : > { %1139 = vst [vmem:[%s4199_s12 + $0x20] sm:$0xff] %v957_v11  ;;  %1161 = vst [vmem:[%s4199_s12 + $0xd0] sm:$0xff] %v1023_v18 }
 0x234   : > { %1140 = vst [vmem:[%s4199_s12 + $0x28] sm:$0xff] %v959_v25  ;;  %1162 = vst [vmem:[%s4199_s12 + $0xd8] sm:$0xff] %v1025_v58  ;;  %v962_v29 = vpop.f32.mrb[30].mxu0  ;;  %v1028_v23 = vpop.f32.mrb[6].mxu1 }
 0x235   : > { %v963_v34 = vadd.f32 %v962_v29, %v3868_v36  ;;  %v1029_v1 = vadd.f32 %v1028_v23, %v3970_v62  ;;  %v964_v35 = vpop.f32.mrb[31].mxu0  ;;  %v1030_v33 = vpop.f32.mrb[7].mxu1 }
 0x236   : > { %v965_v42 = vadd.f32 %v964_v35, %v3868_v36  ;;  %v1031_v59 = vadd.f32 %v1030_v33, %v3970_v62  ;;  %v4249_v58 = vpop.permute.xlu1 %1350 }
 0x237   : > { %1141 = vst [vmem:[%s4199_s12 + $0x30] sm:$0xff] %v963_v34  ;;  %1163 = vst [vmem:[%s4199_s12 + $0xe0] sm:$0xff] %v1029_v1 }
 0x238   : > { %1142 = vst [vmem:[%s4199_s12 + $0x38] sm:$0xff] %v965_v42  ;;  %1164 = vst [vmem:[%s4199_s12 + $0xe8] sm:$0xff] %v1031_v59  ;;  %v968_v55 = vpop.f32.mrb[32].mxu0  ;;  %v1034_v46 = vpop.f32.mrb[8].mxu1 }
 0x239   : > { %v969_v49 = vadd.f32 %v968_v55, %v3880_v22  ;;  %v1035_v37 = vadd.f32 %v1034_v46, %v3982_v2  ;;  %v970_v56 = vpop.f32.mrb[33].mxu0  ;;  %v1036_v36 = vpop.f32.mrb[9].mxu1 }
 0x23a   : > { %v971_v60 = vadd.f32 %v970_v56, %v3880_v22  ;;  %v1037_v62 = vadd.f32 %v1036_v36, %v3982_v2  ;;  %v4259_v42 = vpop.permute.xlu0 %1355  ;;  %v4269_v36 = vpop.permute.xlu1 %1360 }
 0x23b   : > { %1143 = vst [vmem:[%s4199_s12 + $0x40] sm:$0xff] %v969_v49  ;;  %1165 = vst [vmem:[%s4199_s12 + $0xf0] sm:$0xff] %v1035_v37 }
 0x23c   : > { %1144 = vst [vmem:[%s4199_s12 + $0x48] sm:$0xff] %v971_v60  ;;  %1166 = vst [vmem:[%s4199_s12 + $0xf8] sm:$0xff] %v1037_v62  ;;  %v974_v8 = vpop.f32.mrb[34].mxu0  ;;  %v1040_v11 = vpop.f32.mrb[10].mxu1 }
 0x23d   : > { %v975_v18 = vadd.f32 %v974_v8, %v3882_v41  ;;  %v1041_v24 = vadd.f32 %v1040_v11, %v3994_v5  ;;  %v976_v31 = vpop.f32.mrb[35].mxu0  ;;  %v1042_v22 = vpop.f32.mrb[11].mxu1 }
 0x23e   : > { %v977_v25 = vadd.f32 %v976_v31, %v3882_v41  ;;  %v1043_v2 = vadd.f32 %v1042_v22, %v3994_v5  ;;  %v4279_v31 = vpop.permute.xlu0 %1365 }
 0x23f   : > { %1145 = vst [vmem:[%s4199_s12 + $0x50] sm:$0xff] %v975_v18  ;;  %1167 = vst [vmem:[%s4199_s12 + $0x100] sm:$0xff] %v1041_v24 }
 0x240   : > { %1146 = vst [vmem:[%s4199_s12 + $0x58] sm:$0xff] %v977_v25  ;;  %1168 = vst [vmem:[%s4199_s12 + $0x108] sm:$0xff] %v1043_v2  ;;  %v980_v29 = vpop.f32.mrb[36].mxu0  ;;  %v1046_v23 = vpop.f32.mrb[12].mxu1 }
 0x241   : > { %v981_v34 = vadd.f32 %v980_v29, %v3894_v44  ;;  %v1047_v1 = vadd.f32 %v1046_v23, %v3996_v6  ;;  %v982_v35 = vpop.f32.mrb[37].mxu0  ;;  %v1048_v41 = vpop.f32.mrb[13].mxu1 }
 0x242   : > { %v983_v33 = vadd.f32 %v982_v35, %v3894_v44  ;;  %v1049_v5 = vadd.f32 %v1048_v41, %v3996_v6 }
 0x243   : > { %1147 = vst [vmem:[%s4199_s12 + $0x60] sm:$0xff] %v981_v34  ;;  %1169 = vst [vmem:[%s4199_s12 + $0x110] sm:$0xff] %v1047_v1  ;;  %v4289_v1 = vpop.permute.xlu1 %1370 }
 0x244   : > { %1148 = vst [vmem:[%s4199_s12 + $0x68] sm:$0xff] %v983_v33  ;;  %1170 = vst [vmem:[%s4199_s12 + $0x118] sm:$0xff] %v1049_v5  ;;  %v986_v59 = vpop.f32.mrb[38].mxu0  ;;  %v1052_v55 = vpop.f32.mrb[14].mxu1 }
 0x245   : > { %v987_v46 = vadd.f32 %v986_v59, %v3906_v47  ;;  %v1053_v49 = vadd.f32 %v1052_v55, %v4008_v9  ;;  %v988_v37 = vpop.f32.mrb[39].mxu0  ;;  %v1054_v44 = vpop.f32.mrb[15].mxu1 }
 0x246   : > { %v989_v56 = vadd.f32 %v988_v37, %v3906_v47  ;;  %v1055_v6 = vadd.f32 %v1054_v44, %v4008_v9 }
 0x247   : > { %1149 = vst [vmem:[%s4199_s12 + $0x70] sm:$0xff] %v987_v46  ;;  %1171 = vst [vmem:[%s4199_s12 + $0x120] sm:$0xff] %v1053_v49  ;;  %v4299_v46 = vpop.permute.xlu0 %1375 }
 0x248   : > { %1150 = vst [vmem:[%s4199_s12 + $0x78] sm:$0xff] %v989_v56  ;;  %1172 = vst [vmem:[%s4199_s12 + $0x128] sm:$0xff] %v1055_v6  ;;  %v992_v60 = vpop.f32.mrb[40].mxu0  ;;  %v1058_v62 = vpop.f32.mrb[16].mxu1 }
 0x249   : > { %v993_v8 = vadd.f32 %v992_v60, %v3918_v50  ;;  %v1059_v11 = vadd.f32 %v1058_v62, %v4020_v12  ;;  %v994_v18 = vpop.f32.mrb[41].mxu0  ;;  %v1060_v47 = vpop.f32.mrb[17].mxu1 }
 0x24a   : > { %v995_v24 = vadd.f32 %v994_v18, %v3918_v50  ;;  %v1061_v9 = vadd.f32 %v1060_v47, %v4020_v12  ;;  %v4309_v62 = vpop.permute.xlu1 %1380 }
 0x24b   : > { %1151 = vst [vmem:[%s4199_s12 + $0x80] sm:$0xff] %v993_v8  ;;  %1173 = vst [vmem:[%s4199_s12 + $0x130] sm:$0xff] %v1059_v11 }
 0x24c   : > { %1152 = vst [vmem:[%s4199_s12 + $0x88] sm:$0xff] %v995_v24  ;;  %1174 = vst [vmem:[%s4199_s12 + $0x138] sm:$0xff] %v1061_v9  ;;  %v998_v22 = vpop.f32.mrb[42].mxu0  ;;  %v1064_v25 = vpop.f32.mrb[18].mxu1 }
 0x24d   : > { %v999_v2 = vadd.f32 %v998_v22, %v3920_v52  ;;  %v1065_v29 = vadd.f32 %v1064_v25, %v4032_v15  ;;  %v1000_v23 = vpop.f32.mrb[43].mxu0  ;;  %v1066_v50 = vpop.f32.mrb[19].mxu1 }
 0x24e   : > { %v1001_v34 = vadd.f32 %v1000_v23, %v3920_v52  ;;  %v1067_v12 = vadd.f32 %v1066_v50, %v4032_v15  ;;  %v4319_v22 = vpop.permute.xlu0 %1385 }
 0x24f   : > { %1153 = vst [vmem:[%s4199_s12 + $0x90] sm:$0xff] %v999_v2  ;;  %1175 = vst [vmem:[%s4199_s12 + $0x140] sm:$0xff] %v1065_v29 }
 0x250   : > { %1154 = vst [vmem:[%s4199_s12 + $0x98] sm:$0xff] %v1001_v34  ;;  %1176 = vst [vmem:[%s4199_s12 + $0x148] sm:$0xff] %v1067_v12  ;;  %v1004_v35 = vpop.f32.mrb[44].mxu0  ;;  %v1070_v41 = vpop.f32.mrb[20].mxu1 }
 0x251   : > { %v1005_v33 = vadd.f32 %v1004_v35, %v3932_v39  ;;  %v1071_v5 = vadd.f32 %v1070_v41, %v4034_v16  ;;  %v1006_v59 = vpop.f32.mrb[45].mxu0  ;;  %v1072_v52 = vpop.f32.mrb[21].mxu1 }
 0x252   : > { %v1007_v55 = vadd.f32 %v1006_v59, %v3932_v39  ;;  %v1073_v15 = vadd.f32 %v1072_v52, %v4034_v16  ;;  %v4329_v12 = vpop.permute.xlu1 %1390 }
 0x253   : > { %1155 = vst [vmem:[%s4199_s12 + $0xa0] sm:$0xff] %v1005_v33  ;;  %1177 = vst [vmem:[%s4199_s12 + $0x150] sm:$0xff] %v1071_v5 }
 0x254   : > { %1156 = vst [vmem:[%s4199_s12 + $0xa8] sm:$0xff] %v1007_v55  ;;  %1178 = vst [vmem:[%s4199_s12 + $0x158] sm:$0xff] %v1073_v15  ;;  %v1076_v49 = vpop.f32.mrb[22].mxu1  ;;  %v1585_v37 = vpop.f32.mrb[46].mxu0 }
 0x255   : > { %v1077_v44 = vadd.f32 %v1076_v49, %v4046_v20  ;;  %v1586_v56 = vadd.f32 %v1585_v37, %v4132_v51  ;;  %v1078_v6 = vpop.f32.mrb[23].mxu1  ;;  %v1587_v39 = vpop.f32.mrb[47].mxu0 }
 0x256   : > { %v1079_v60 = vadd.f32 %v1078_v6, %v4046_v20  ;;  %v1588_v16 = vadd.f32 %v1587_v39, %v4132_v51  ;;  %v4339_v55 = vpop.permute.xlu0 %1395  ;;  %v4349_v39 = vpop.permute.xlu1 %1400 }
 0x257   : > { %1179 = vst [vmem:[%s4199_s12 + $0x160] sm:$0xff] %v1077_v44  ;;  %1776 = vst [vmem:[%s4199_s12 + $0x200] sm:$0xff] %v1586_v56 }
 0x258   : > { %1180 = vst [vmem:[%s4199_s12 + $0x168] sm:$0xff] %v1079_v60  ;;  %1777 = vst [vmem:[%s4199_s12 + $0x208] sm:$0xff] %v1588_v16  ;;  %v1082_v8 = vpop.f32.mrb[24].mxu1  ;;  %v1591_v11 = vpop.f32.mrb[48].mxu0 }
 0x259   : > { %v1083_v18 = vadd.f32 %v1082_v8, %v4058_v17  ;;  %v1592_v47 = vadd.f32 %v1591_v11, %v4134_v53  ;;  %v1084_v24 = vpop.f32.mrb[25].mxu1  ;;  %v1593_v20 = vpop.f32.mrb[49].mxu0 }
 0x25a   : > { %v1085_v9 = vadd.f32 %v1084_v24, %v4058_v17  ;;  %v1594_v51 = vadd.f32 %v1593_v20, %v4134_v53  ;;  %v4359_v24 = vpop.permute.xlu0 %1405 }
 0x25b   : > { %1181 = vst [vmem:[%s4199_s12 + $0x170] sm:$0xff] %v1083_v18  ;;  %1778 = vst [vmem:[%s4199_s12 + $0x210] sm:$0xff] %v1592_v47 }
 0x25c   : > { %1182 = vst [vmem:[%s4199_s12 + $0x178] sm:$0xff] %v1085_v9  ;;  %1779 = vst [vmem:[%s4199_s12 + $0x218] sm:$0xff] %v1594_v51  ;;  %v1088_v25 = vpop.f32.mrb[26].mxu1  ;;  %v1597_v2 = vpop.f32.mrb[50].mxu0 }
 0x25d   : > { %v1089_v29 = vadd.f32 %v1088_v25, %v4070_v27  ;;  %v1598_v23 = vadd.f32 %v1597_v2, %v4141_v57  ;;  %v1090_v50 = vpop.f32.mrb[27].mxu1  ;;  %v1599_v17 = vpop.f32.mrb[51].mxu0 }
 0x25e   : > { %v1091_v34 = vadd.f32 %v1090_v50, %v4070_v27  ;;  %v1600_v53 = vadd.f32 %v1599_v17, %v4141_v57 }
 0x25f   : > { %1183 = vst [vmem:[%s4199_s12 + $0x180] sm:$0xff] %v1089_v29  ;;  %1780 = vst [vmem:[%s4199_s12 + $0x220] sm:$0xff] %v1598_v23  ;;  %v4369_v23 = vpop.permute.xlu1 %1410 }
 0x260   : > { %1184 = vst [vmem:[%s4199_s12 + $0x188] sm:$0xff] %v1091_v34  ;;  %1781 = vst [vmem:[%s4199_s12 + $0x228] sm:$0xff] %v1600_v53  ;;  %v1094_v35 = vpop.f32.mrb[28].mxu1  ;;  %v1603_v41 = vpop.f32.mrb[52].mxu0 }
 0x261   : > { %v1095_v33 = vadd.f32 %v1094_v35, %v4072_v28  ;;  %v1604_v5 = vadd.f32 %v1603_v41, %v4148_v61  ;;  %v1096_v59 = vpop.f32.mrb[29].mxu1  ;;  %v1605_v27 = vpop.f32.mrb[53].mxu0 }
 0x262   : > { %v1097_v52 = vadd.f32 %v1096_v59, %v4072_v28  ;;  %v1606_v57 = vadd.f32 %v1605_v27, %v4148_v61 }
 0x263   : > { %1185 = vst [vmem:[%s4199_s12 + $0x190] sm:$0xff] %v1095_v33  ;;  %1782 = vst [vmem:[%s4199_s12 + $0x230] sm:$0xff] %v1604_v5  ;;  %v4379_v33 = vpop.permute.xlu0 %1415 }
 0x264   : > { %1186 = vst [vmem:[%s4199_s12 + $0x198] sm:$0xff] %v1097_v52  ;;  %1783 = vst [vmem:[%s4199_s12 + $0x238] sm:$0xff] %v1606_v57  ;;  %v1100_v15 = vpop.f32.mrb[30].mxu1  ;;  %v1609_v49 = vpop.f32.mrb[54].mxu0 }
 0x265   : > { %v1101_v37 = vadd.f32 %v1100_v15, %v4084_v32  ;;  %v1610_v44 = vadd.f32 %v1609_v49, %v4155_v0  ;;  %v1102_v56 = vpop.f32.mrb[31].mxu1  ;;  %v1611_v28 = vpop.f32.mrb[55].mxu0 }
 0x266   : > { %v1103_v6 = vadd.f32 %v1102_v56, %v4084_v32  ;;  %v1612_v61 = vadd.f32 %v1611_v28, %v4155_v0  ;;  %v4389_v49 = vpop.permute.xlu1 %1420 }
 0x267   : > { %1187 = vst [vmem:[%s4199_s12 + $0x1a0] sm:$0xff] %v1101_v37  ;;  %1784 = vst [vmem:[%s4199_s12 + $0x240] sm:$0xff] %v1610_v44 }
 0x268   : > { %1188 = vst [vmem:[%s4199_s12 + $0x1a8] sm:$0xff] %v1103_v6  ;;  %1785 = vst [vmem:[%s4199_s12 + $0x248] sm:$0xff] %v1612_v61  ;;  %v1106_v60 = vpop.f32.mrb[32].mxu1  ;;  %v1615_v16 = vpop.f32.mrb[56].mxu0 }
 0x269   : > { %v1107_v8 = vadd.f32 %v1106_v60, %v4096_v38  ;;  %v1616_v11 = vadd.f32 %v1615_v16, %v4157_v3  ;;  %v1108_v18 = vpop.f32.mrb[33].mxu1  ;;  %v1617_v32 = vpop.f32.mrb[57].mxu0 }
 0x26a   : > { %v1109_v47 = vadd.f32 %v1108_v18, %v4096_v38  ;;  %v1618_v0 = vadd.f32 %v1617_v32, %v4157_v3  ;;  %v1907_v60 = vpop.permute.xlu0 %1906 }
 0x26b   : > { %1189 = vst [vmem:[%s4199_s12 + $0x1b0] sm:$0xff] %v1107_v8  ;;  %1786 = vst [vmem:[%s4199_s12 + $0x250] sm:$0xff] %v1616_v11 }
 0x26c   : > { %1190 = vst [vmem:[%s4199_s12 + $0x1b8] sm:$0xff] %v1109_v47  ;;  %1787 = vst [vmem:[%s4199_s12 + $0x258] sm:$0xff] %v1618_v0  ;;  %v1112_v20 = vpop.f32.mrb[34].mxu1  ;;  %v1621_v9 = vpop.f32.mrb[58].mxu0 }
 0x26d   : > { %v1113_v51 = vadd.f32 %v1112_v20, %v4108_v43  ;;  %v1622_v25 = vadd.f32 %v1621_v9, %v4164_v7  ;;  %v1114_v2 = vpop.f32.mrb[35].mxu1  ;;  %v1623_v38 = vpop.f32.mrb[59].mxu0 }
 0x26e   : > { %v1115_v29 = vadd.f32 %v1114_v2, %v4108_v43  ;;  %v1624_v3 = vadd.f32 %v1623_v38, %v4164_v7 }
 0x26f   : > { %1191 = vst [vmem:[%s4199_s12 + $0x1c0] sm:$0xff] %v1113_v51  ;;  %1788 = vst [vmem:[%s4199_s12 + $0x260] sm:$0xff] %v1622_v25 }
 0x270   : > { %1192 = vst [vmem:[%s4199_s12 + $0x1c8] sm:$0xff] %v1115_v29  ;;  %1789 = vst [vmem:[%s4199_s12 + $0x268] sm:$0xff] %v1624_v3  ;;  %v1118_v50 = vpop.f32.mrb[36].mxu1  ;;  %v1627_v17 = vpop.f32.mrb[60].mxu0 }
 0x271   : > { %v1119_v34 = vadd.f32 %v1118_v50, %v4110_v45  ;;  %v1628_v53 = vadd.f32 %v1627_v17, %v4171_v10  ;;  %v1120_v35 = vpop.f32.mrb[37].mxu1  ;;  %v1629_v43 = vpop.f32.mrb[61].mxu0 }
 0x272   : > { %v1121_v41 = vadd.f32 %v1120_v35, %v4110_v45  ;;  %v1630_v7 = vadd.f32 %v1629_v43, %v4171_v10  ;;  %v1917_v3 = vpop.permute.xlu0 %1916 }
 0x273   : > { %1193 = vst [vmem:[%s4199_s12 + $0x1d0] sm:$0xff] %v1119_v34  ;;  %1790 = vst [vmem:[%s4199_s12 + $0x270] sm:$0xff] %v1628_v53 }
 0x274   : > { %1194 = vst [vmem:[%s4199_s12 + $0x1d8] sm:$0xff] %v1121_v41  ;;  %1791 = vst [vmem:[%s4199_s12 + $0x278] sm:$0xff] %v1630_v7  ;;  %v1124_v5 = vpop.f32.mrb[38].mxu1  ;;  %v1633_v59 = vpop.f32.mrb[62].mxu0 }
 0x275   : > { %v1125_v27 = vadd.f32 %v1124_v5, %v4118_v48  ;;  %v1634_v52 = vadd.f32 %v1633_v59, %v4178_v13  ;;  %v1126_v57 = vpop.f32.mrb[39].mxu1  ;;  %v1635_v45 = vpop.f32.mrb[63].mxu0 }
 0x276   : > { %v1127_v15 = vadd.f32 %v1126_v57, %v4118_v48  ;;  %v1636_v10 = vadd.f32 %v1635_v45, %v4178_v13 }
 0x277   : > { %1195 = vst [vmem:[%s4199_s12 + $0x1e0] sm:$0xff] %v1125_v27  ;;  %1792 = vst [vmem:[%s4199_s12 + $0x280] sm:$0xff] %v1634_v52 }
 0x278   : > { %1196 = vst [vmem:[%s4199_s12 + $0x1e8] sm:$0xff] %v1127_v15  ;;  %1793 = vst [vmem:[%s4199_s12 + $0x288] sm:$0xff] %v1636_v10  ;;  %v1130_v37 = vpop.f32.mrb[40].mxu1  ;;  %v1639_v44 = vpop.f32.mrb[64].mxu0 }
 0x279   : > { %v1131_v56 = vadd.f32 %v1130_v37, %v4125_v54  ;;  %v1640_v28 = vadd.f32 %v1639_v44, %v4180_v14  ;;  %v1132_v6 = vpop.f32.mrb[41].mxu1  ;;  %v1641_v48 = vpop.f32.mrb[65].mxu0 }
 0x27a   : > { %v1133_v61 = vadd.f32 %v1132_v6, %v4125_v54  ;;  %v1642_v13 = vadd.f32 %v1641_v48, %v4180_v14  ;;  %v1912_v14 = vpop.permute.xlu1 %1911  ;;  %v1927_v10 = vpop.permute.xlu0 %1926 }
 0x27b   : > { %1197 = vst [vmem:[%s4199_s12 + $0x1f0] sm:$0xff] %v1131_v56  ;;  %1794 = vst [vmem:[%s4199_s12 + $0x290] sm:$0xff] %v1640_v28 }
 0x27c   : > { %1198 = vst [vmem:[%s4199_s12 + $0x1f8] sm:$0xff] %v1133_v61  ;;  %1795 = vst [vmem:[%s4199_s12 + $0x298] sm:$0xff] %v1642_v13  ;;  %v1645_v16 = vpop.f32.mrb[66].mxu0  ;;  %v2226_v8 = vpop.f32.mrb[42].mxu1 }
 0x27d   : > { %v1646_v11 = vadd.f32 %v1645_v16, %v4188_v19  ;;  %v2227_v18 = vadd.f32 %v2226_v8, %v1907_v60  ;;  %v1647_v32 = vpop.f32.mrb[67].mxu0  ;;  %v2228_v47 = vpop.f32.mrb[43].mxu1 }
 0x27e   : > { %v1648_v54 = vadd.f32 %v1647_v32, %v4188_v19  ;;  %v2229_v0 = vadd.f32 %v2228_v47, %v1907_v60  ;;  %v1922_v7 = vpop.permute.xlu1 %1921 }
 0x27f   : > { %1796 = vst [vmem:[%s4199_s12 + $0x2a0] sm:$0xff] %v1646_v11  ;;  %2417 = vst [vmem:[%s4199_s12 + $0x400] sm:$0xff] %v2227_v18 }
 0x280   : > { %1797 = vst [vmem:[%s4199_s12 + $0x2a8] sm:$0xff] %v1648_v54  ;;  %2418 = vst [vmem:[%s4199_s12 + $0x408] sm:$0xff] %v2229_v0  ;;  %v1651_v20 = vpop.f32.mrb[68].mxu0  ;;  %v2232_v9 = vpop.f32.mrb[44].mxu1 }
 0x281   : > { %v1652_v51 = vadd.f32 %v1651_v20, %v4191_v21  ;;  %v2233_v25 = vadd.f32 %v2232_v9, %v1912_v14  ;;  %v1653_v2 = vpop.f32.mrb[69].mxu0  ;;  %v2234_v38 = vpop.f32.mrb[45].mxu1 }
 0x282   : > { %v1654_v29 = vadd.f32 %v1653_v2, %v4191_v21  ;;  %v2235_v19 = vadd.f32 %v2234_v38, %v1912_v14  ;;  %v1932_v13 = vpop.permute.xlu1 %1931  ;;  %v1937_v54 = vpop.permute.xlu0 %1936 }
 0x283   : > { %1798 = vst [vmem:[%s4199_s12 + $0x2b0] sm:$0xff] %v1652_v51  ;;  %2419 = vst [vmem:[%s4199_s12 + $0x410] sm:$0xff] %v2233_v25 }
 0x284   : > { %1799 = vst [vmem:[%s4199_s12 + $0x2b8] sm:$0xff] %v1654_v29  ;;  %2420 = vst [vmem:[%s4199_s12 + $0x418] sm:$0xff] %v2235_v19  ;;  %v1657_v50 = vpop.f32.mrb[70].mxu0  ;;  %v2238_v17 = vpop.f32.mrb[46].mxu1 }
 0x285   : > { %v1658_v34 = vadd.f32 %v1657_v50, %v4197_v40  ;;  %v2239_v53 = vadd.f32 %v2238_v17, %v1917_v3  ;;  %v1659_v35 = vpop.f32.mrb[71].mxu0  ;;  %v2240_v43 = vpop.f32.mrb[47].mxu1 }
 0x286   : > { %v1660_v41 = vadd.f32 %v1659_v35, %v4197_v40  ;;  %v2241_v21 = vadd.f32 %v2240_v43, %v1917_v3  ;;  %v1942_v38 = vpop.permute.xlu1 %1941  ;;  %v1947_v35 = vpop.permute.xlu0 %1946 }
 0x287   : > { %1800 = vst [vmem:[%s4199_s12 + $0x2c0] sm:$0xff] %v1658_v34  ;;  %2421 = vst [vmem:[%s4199_s12 + $0x420] sm:$0xff] %v2239_v53 }
 0x288   : > { %1801 = vst [vmem:[%s4199_s12 + $0x2c8] sm:$0xff] %v1660_v41  ;;  %2422 = vst [vmem:[%s4199_s12 + $0x428] sm:$0xff] %v2241_v21  ;;  %v1663_v5 = vpop.f32.mrb[72].mxu0  ;;  %v2244_v59 = vpop.f32.mrb[48].mxu1 }
 0x289   : > { %v1664_v27 = vadd.f32 %v1663_v5, %v4209_v63  ;;  %v2245_v52 = vadd.f32 %v2244_v59, %v1922_v7  ;;  %v1665_v57 = vpop.f32.mrb[73].mxu0  ;;  %v2246_v45 = vpop.f32.mrb[49].mxu1 }
 0x28a   : > { %v1666_v15 = vadd.f32 %v1665_v57, %v4209_v63  ;;  %v2247_v40 = vadd.f32 %v2246_v45, %v1922_v7 }
 0x28b   : > { %1802 = vst [vmem:[%s4199_s12 + $0x2d0] sm:$0xff] %v1664_v27  ;;  %2423 = vst [vmem:[%s4199_s12 + $0x430] sm:$0xff] %v2245_v52  ;;  %v1952_v52 = vpop.permute.xlu1 %1951 }
 0x28c   : > { %1803 = vst [vmem:[%s4199_s12 + $0x2d8] sm:$0xff] %v1666_v15  ;;  %2424 = vst [vmem:[%s4199_s12 + $0x438] sm:$0xff] %v2247_v40  ;;  %v1669_v37 = vpop.f32.mrb[74].mxu0  ;;  %v2250_v44 = vpop.f32.mrb[50].mxu1 }
 0x28d   : > { %v1670_v56 = vadd.f32 %v1669_v37, %v4219_v26  ;;  %v2251_v28 = vadd.f32 %v2250_v44, %v1927_v10  ;;  %v1671_v6 = vpop.f32.mrb[75].mxu0  ;;  %v2252_v48 = vpop.f32.mrb[51].mxu1 }
 0x28e   : > { %v1672_v61 = vadd.f32 %v1671_v6, %v4219_v26  ;;  %v2253_v63 = vadd.f32 %v2252_v48, %v1927_v10 }
 0x28f   : > { %1804 = vst [vmem:[%s4199_s12 + $0x2e0] sm:$0xff] %v1670_v56  ;;  %2425 = vst [vmem:[%s4199_s12 + $0x440] sm:$0xff] %v2251_v28  ;;  %v1957_v56 = vpop.permute.xlu0 %1956 }
 0x290   : > { %1805 = vst [vmem:[%s4199_s12 + $0x2e8] sm:$0xff] %v1672_v61  ;;  %2426 = vst [vmem:[%s4199_s12 + $0x448] sm:$0xff] %v2253_v63  ;;  %v1675_v60 = vpop.f32.mrb[76].mxu0  ;;  %v2256_v16 = vpop.f32.mrb[52].mxu1 }
 0x291   : > { %v1676_v8 = vadd.f32 %v1675_v60, %v4229_v30  ;;  %v2257_v11 = vadd.f32 %v2256_v16, %v1932_v13  ;;  %v1677_v18 = vpop.f32.mrb[77].mxu0  ;;  %v2258_v32 = vpop.f32.mrb[53].mxu1 }
 0x292   : > { %v1678_v47 = vadd.f32 %v1677_v18, %v4229_v30  ;;  %v2259_v26 = vadd.f32 %v2258_v32, %v1932_v13  ;;  %v1962_v16 = vpop.permute.xlu1 %1961 }
 0x293   : > { %1806 = vst [vmem:[%s4199_s12 + $0x2f0] sm:$0xff] %v1676_v8  ;;  %2427 = vst [vmem:[%s4199_s12 + $0x450] sm:$0xff] %v2257_v11 }
 0x294   : > { %1807 = vst [vmem:[%s4199_s12 + $0x2f8] sm:$0xff] %v1678_v47  ;;  %2428 = vst [vmem:[%s4199_s12 + $0x458] sm:$0xff] %v2259_v26  ;;  %v1681_v0 = vpop.f32.mrb[78].mxu0  ;;  %v2262_v14 = vpop.f32.mrb[54].mxu1 }
 0x295   : > { %v1682_v20 = vadd.f32 %v1681_v0, %v4239_v4  ;;  %v2263_v9 = vadd.f32 %v2262_v14, %v1937_v54  ;;  %v1683_v51 = vpop.f32.mrb[79].mxu0  ;;  %v2264_v25 = vpop.f32.mrb[55].mxu1 }
 0x296   : > { %v1684_v2 = vadd.f32 %v1683_v51, %v4239_v4  ;;  %v2265_v30 = vadd.f32 %v2264_v25, %v1937_v54  ;;  %v1967_v0 = vpop.permute.xlu0 %1966 }
 0x297   : > { %1808 = vst [vmem:[%s4199_s12 + $0x300] sm:$0xff] %v1682_v20  ;;  %2429 = vst [vmem:[%s4199_s12 + $0x460] sm:$0xff] %v2263_v9 }
 0x298   : > { %1809 = vst [vmem:[%s4199_s12 + $0x308] sm:$0xff] %v1684_v2  ;;  %2430 = vst [vmem:[%s4199_s12 + $0x468] sm:$0xff] %v2265_v30  ;;  %v1687_v29 = vpop.f32.mrb[80].mxu0  ;;  %v2268_v19 = vpop.f32.mrb[56].mxu1 }
 0x299   : > { %v1688_v3 = vadd.f32 %v1687_v29, %v4249_v58  ;;  %v2269_v50 = vadd.f32 %v2268_v19, %v1942_v38  ;;  %v1689_v17 = vpop.f32.mrb[81].mxu0  ;;  %v2270_v34 = vpop.f32.mrb[57].mxu1 }
 0x29a   : > { %v1690_v53 = vadd.f32 %v1689_v17, %v4249_v58  ;;  %v2271_v4 = vadd.f32 %v2270_v34, %v1942_v38  ;;  %v1972_v38 = vpop.permute.xlu1 %1971 }
 0x29b   : > { %1810 = vst [vmem:[%s4199_s12 + $0x310] sm:$0xff] %v1688_v3  ;;  %2431 = vst [vmem:[%s4199_s12 + $0x470] sm:$0xff] %v2269_v50 }
 0x29c   : > { %1811 = vst [vmem:[%s4199_s12 + $0x318] sm:$0xff] %v1690_v53  ;;  %2432 = vst [vmem:[%s4199_s12 + $0x478] sm:$0xff] %v2271_v4  ;;  %v1693_v43 = vpop.f32.mrb[82].mxu0  ;;  %v2274_v41 = vpop.f32.mrb[58].mxu1 }
 0x29d   : > { %v1694_v21 = vadd.f32 %v1693_v43, %v4259_v42  ;;  %v2275_v7 = vadd.f32 %v2274_v41, %v1947_v35  ;;  %v1695_v5 = vpop.f32.mrb[83].mxu0  ;;  %v2276_v59 = vpop.f32.mrb[59].mxu1 }
 0x29e   : > { %v1696_v27 = vadd.f32 %v1695_v5, %v4259_v42  ;;  %v2277_v58 = vadd.f32 %v2276_v59, %v1947_v35  ;;  %v1977_v4 = vpop.permute.xlu0 %1976 }
 0x29f   : > { %1812 = vst [vmem:[%s4199_s12 + $0x320] sm:$0xff] %v1694_v21  ;;  %2433 = vst [vmem:[%s4199_s12 + $0x480] sm:$0xff] %v2275_v7 }
 0x2a0   : > { %1813 = vst [vmem:[%s4199_s12 + $0x328] sm:$0xff] %v1696_v27  ;;  %2434 = vst [vmem:[%s4199_s12 + $0x488] sm:$0xff] %v2277_v58  ;;  %v1699_v57 = vpop.f32.mrb[84].mxu0  ;;  %v2280_v45 = vpop.f32.mrb[60].mxu1 }
 0x2a1   : > { %v1700_v15 = vadd.f32 %v1699_v57, %v4269_v36  ;;  %v2281_v40 = vadd.f32 %v2280_v45, %v1952_v52  ;;  %v1701_v10 = vpop.f32.mrb[85].mxu0  ;;  %v2282_v37 = vpop.f32.mrb[61].mxu1 }
 0x2a2   : > { %v1702_v44 = vadd.f32 %v1701_v10, %v4269_v36  ;;  %v2283_v42 = vadd.f32 %v2282_v37, %v1952_v52  ;;  %v1982_v27 = vpop.permute.xlu1 %1981  ;;  %v1987_v37 = vpop.permute.xlu0 %1986 }
 0x2a3   : > { %1814 = vst [vmem:[%s4199_s12 + $0x330] sm:$0xff] %v1700_v15  ;;  %2435 = vst [vmem:[%s4199_s12 + $0x490] sm:$0xff] %v2281_v40 }
 0x2a4   : > { %1815 = vst [vmem:[%s4199_s12 + $0x338] sm:$0xff] %v1702_v44  ;;  %2436 = vst [vmem:[%s4199_s12 + $0x498] sm:$0xff] %v2283_v42  ;;  %v1705_v28 = vpop.f32.mrb[86].mxu0  ;;  %v2286_v6 = vpop.f32.mrb[62].mxu1 }
 0x2a5   : > { %v1706_v48 = vadd.f32 %v1705_v28, %v4279_v31  ;;  %v2287_v61 = vadd.f32 %v2286_v6, %v1957_v56  ;;  %v1707_v63 = vpop.f32.mrb[87].mxu0  ;;  %v2288_v13 = vpop.f32.mrb[63].mxu1 }
 0x2a6   : > { %v1708_v60 = vadd.f32 %v1707_v63, %v4279_v31  ;;  %v2289_v36 = vadd.f32 %v2288_v13, %v1957_v56  ;;  %v1992_v63 = vpop.permute.xlu1 %1991 }
 0x2a7   : > { %1816 = vst [vmem:[%s4199_s12 + $0x340] sm:$0xff] %v1706_v48  ;;  %2437 = vst [vmem:[%s4199_s12 + $0x4a0] sm:$0xff] %v2287_v61 }
 0x2a8   : > { %1817 = vst [vmem:[%s4199_s12 + $0x348] sm:$0xff] %v1708_v60  ;;  %2438 = vst [vmem:[%s4199_s12 + $0x4a8] sm:$0xff] %v2289_v36  ;;  %v1711_v8 = vpop.f32.mrb[88].mxu0  ;;  %v2292_v11 = vpop.f32.mrb[64].mxu1 }
 0x2a9   : > { %v1712_v18 = vadd.f32 %v1711_v8, %v4289_v1  ;;  %v2293_v32 = vadd.f32 %v2292_v11, %v1962_v16  ;;  %v1713_v47 = vpop.f32.mrb[89].mxu0  ;;  %v2294_v26 = vpop.f32.mrb[65].mxu1 }
 0x2aa   : > { %v1714_v54 = vadd.f32 %v1713_v47, %v4289_v1  ;;  %v2295_v31 = vadd.f32 %v2294_v26, %v1962_v16 }
 0x2ab   : > { %1818 = vst [vmem:[%s4199_s12 + $0x350] sm:$0xff] %v1712_v18  ;;  %2439 = vst [vmem:[%s4199_s12 + $0x4b0] sm:$0xff] %v2293_v32  ;;  %v1997_v32 = vpop.permute.xlu0 %1996 }
 0x2ac   : > { %1819 = vst [vmem:[%s4199_s12 + $0x358] sm:$0xff] %v1714_v54  ;;  %2440 = vst [vmem:[%s4199_s12 + $0x4b8] sm:$0xff] %v2295_v31  ;;  %v1717_v14 = vpop.f32.mrb[90].mxu0  ;;  %v2298_v20 = vpop.f32.mrb[66].mxu1 }
 0x2ad   : > { %v1718_v9 = vadd.f32 %v1717_v14, %v4299_v46  ;;  %v2299_v51 = vadd.f32 %v2298_v20, %v1967_v0  ;;  %v1719_v25 = vpop.f32.mrb[91].mxu0  ;;  %v2300_v2 = vpop.f32.mrb[67].mxu1 }
 0x2ae   : > { %v1720_v30 = vadd.f32 %v1719_v25, %v4299_v46  ;;  %v2301_v1 = vadd.f32 %v2300_v2, %v1967_v0 }
 0x2af   : > { %1820 = vst [vmem:[%s4199_s12 + $0x360] sm:$0xff] %v1718_v9  ;;  %2441 = vst [vmem:[%s4199_s12 + $0x4c0] sm:$0xff] %v2299_v51  ;;  %v2002_v9 = vpop.permute.xlu1 %2001 }
 0x2b0   : > { %1821 = vst [vmem:[%s4199_s12 + $0x368] sm:$0xff] %v1720_v30  ;;  %2442 = vst [vmem:[%s4199_s12 + $0x4c8] sm:$0xff] %v2301_v1  ;;  %v1723_v29 = vpop.f32.mrb[92].mxu0  ;;  %v2304_v19 = vpop.f32.mrb[68].mxu1 }
 0x2b1   : > { %v1724_v3 = vadd.f32 %v1723_v29, %v4309_v62  ;;  %v2305_v50 = vadd.f32 %v2304_v19, %v1972_v38  ;;  %v1725_v17 = vpop.f32.mrb[93].mxu0  ;;  %v2306_v34 = vpop.f32.mrb[69].mxu1 }
 0x2b2   : > { %v1726_v53 = vadd.f32 %v1725_v17, %v4309_v62  ;;  %v2307_v46 = vadd.f32 %v2306_v34, %v1972_v38  ;;  %v2007_v19 = vpop.permute.xlu0 %2006 }
 0x2b3   : > { %1822 = vst [vmem:[%s4199_s12 + $0x370] sm:$0xff] %v1724_v3  ;;  %2443 = vst [vmem:[%s4199_s12 + $0x4d0] sm:$0xff] %v2305_v50 }
 0x2b4   : > { %1823 = vst [vmem:[%s4199_s12 + $0x378] sm:$0xff] %v1726_v53  ;;  %2444 = vst [vmem:[%s4199_s12 + $0x4d8] sm:$0xff] %v2307_v46  ;;  %v1729_v35 = vpop.f32.mrb[94].mxu0  ;;  %v2310_v43 = vpop.f32.mrb[70].mxu1 }
 0x2b5   : > { %v1730_v41 = vadd.f32 %v1729_v35, %v4319_v22  ;;  %v2311_v21 = vadd.f32 %v2310_v43, %v1977_v4  ;;  %v1731_v7 = vpop.f32.mrb[95].mxu0  ;;  %v2312_v5 = vpop.f32.mrb[71].mxu1 }
 0x2b6   : > { %v1732_v59 = vadd.f32 %v1731_v7, %v4319_v22  ;;  %v2313_v62 = vadd.f32 %v2312_v5, %v1977_v4  ;;  %v2012_v35 = vpop.permute.xlu1 %2011 }
 0x2b7   : > { %1824 = vst [vmem:[%s4199_s12 + $0x380] sm:$0xff] %v1730_v41  ;;  %2445 = vst [vmem:[%s4199_s12 + $0x4e0] sm:$0xff] %v2311_v21 }
 0x2b8   : > { %1825 = vst [vmem:[%s4199_s12 + $0x388] sm:$0xff] %v1732_v59  ;;  %2446 = vst [vmem:[%s4199_s12 + $0x4e8] sm:$0xff] %v2313_v62  ;;  %v1735_v58 = vpop.f32.mrb[96].mxu0  ;;  %v2316_v52 = vpop.f32.mrb[72].mxu1 }
 0x2b9   : > { %v1736_v57 = vadd.f32 %v1735_v58, %v4329_v12  ;;  %v2317_v45 = vadd.f32 %v2316_v52, %v1982_v27  ;;  %v1737_v15 = vpop.f32.mrb[97].mxu0  ;;  %v2318_v40 = vpop.f32.mrb[73].mxu1 }
 0x2ba   : > { %v1738_v10 = vadd.f32 %v1737_v15, %v4329_v12  ;;  %v2319_v22 = vadd.f32 %v2318_v40, %v1982_v27  ;;  %v2017_v27 = vpop.permute.xlu0 %2016  ;;  %v2022_v15 = vpop.permute.xlu1 %2021 }
 0x2bb   : > { %1826 = vst [vmem:[%s4199_s12 + $0x390] sm:$0xff] %v1736_v57  ;;  %2447 = vst [vmem:[%s4199_s12 + $0x4f0] sm:$0xff] %v2317_v45 }
 0x2bc   : > { %1827 = vst [vmem:[%s4199_s12 + $0x398] sm:$0xff] %v1738_v10  ;;  %2448 = vst [vmem:[%s4199_s12 + $0x4f8] sm:$0xff] %v2319_v22  ;;  %v1741_v44 = vpop.f32.mrb[98].mxu0  ;;  %v2322_v42 = vpop.f32.mrb[74].mxu1 }
 0x2bd   : > { %v1742_v56 = vadd.f32 %v1741_v44, %v4339_v55  ;;  %v2323_v28 = vadd.f32 %v2322_v42, %v1987_v37  ;;  %v1743_v6 = vpop.f32.mrb[99].mxu0  ;;  %v2324_v48 = vpop.f32.mrb[75].mxu1 }
 0x2be   : > { %v1744_v61 = vadd.f32 %v1743_v6, %v4339_v55  ;;  %v2325_v12 = vadd.f32 %v2324_v48, %v1987_v37  ;;  %v2027_v37 = vpop.permute.xlu0 %2026  ;;  %v2032_v6 = vpop.permute.xlu1 %2031 }
 0x2bf   : > { %1828 = vst [vmem:[%s4199_s12 + $0x3a0] sm:$0xff] %v1742_v56  ;;  %2449 = vst [vmem:[%s4199_s12 + $0x500] sm:$0xff] %v2323_v28 }
 0x2c0   : > { %1829 = vst [vmem:[%s4199_s12 + $0x3a8] sm:$0xff] %v1744_v61  ;;  %2450 = vst [vmem:[%s4199_s12 + $0x508] sm:$0xff] %v2325_v12  ;;  %v1747_v13 = vpop.f32.mrb[100].mxu0  ;;  %v2328_v60 = vpop.f32.mrb[76].mxu1 }
 0x2c1   : > { %v1748_v36 = vadd.f32 %v1747_v13, %v4349_v39  ;;  %v2329_v16 = vadd.f32 %v2328_v60, %v1992_v63  ;;  %v1749_v8 = vpop.f32.mrb[101].mxu0  ;;  %v2330_v11 = vpop.f32.mrb[77].mxu1 }
 0x2c2   : > { %v1750_v18 = vadd.f32 %v1749_v8, %v4349_v39  ;;  %v2331_v55 = vadd.f32 %v2330_v11, %v1992_v63  ;;  %v2037_v13 = vpop.permute.xlu0 %2036  ;;  %v2042_v11 = vpop.permute.xlu1 %2041 }
 0x2c3   : > { %1830 = vst [vmem:[%s4199_s12 + $0x3b0] sm:$0xff] %v1748_v36  ;;  %2451 = vst [vmem:[%s4199_s12 + $0x510] sm:$0xff] %v2329_v16 }
 0x2c4   : > { %1831 = vst [vmem:[%s4199_s12 + $0x3b8] sm:$0xff] %v1750_v18  ;;  %2452 = vst [vmem:[%s4199_s12 + $0x518] sm:$0xff] %v2331_v55  ;;  %v1753_v47 = vpop.f32.mrb[102].mxu0  ;;  %v2334_v26 = vpop.f32.mrb[78].mxu1 }
 0x2c5   : > { %v1754_v54 = vadd.f32 %v1753_v47, %v4359_v24  ;;  %v2335_v31 = vadd.f32 %v2334_v26, %v1997_v32  ;;  %v1755_v0 = vpop.f32.mrb[103].mxu0  ;;  %v2336_v14 = vpop.f32.mrb[79].mxu1 }
 0x2c6   : > { %v1756_v20 = vadd.f32 %v1755_v0, %v4359_v24  ;;  %v2337_v39 = vadd.f32 %v2336_v14, %v1997_v32  ;;  %v2047_v26 = vpop.permute.xlu0 %2046 }
 0x2c7   : > { %1832 = vst [vmem:[%s4199_s12 + $0x3c0] sm:$0xff] %v1754_v54  ;;  %2453 = vst [vmem:[%s4199_s12 + $0x520] sm:$0xff] %v2335_v31 }
 0x2c8   : > { %1833 = vst [vmem:[%s4199_s12 + $0x3c8] sm:$0xff] %v1756_v20  ;;  %2454 = vst [vmem:[%s4199_s12 + $0x528] sm:$0xff] %v2337_v39  ;;  %v1759_v51 = vpop.f32.mrb[104].mxu0  ;;  %v2340_v25 = vpop.f32.mrb[80].mxu1 }
 0x2c9   : > { %v1760_v2 = vadd.f32 %v1759_v51, %v4369_v23  ;;  %v2341_v30 = vadd.f32 %v2340_v25, %v2002_v9  ;;  %v1761_v1 = vpop.f32.mrb[105].mxu0  ;;  %v2342_v38 = vpop.f32.mrb[81].mxu1 }
 0x2ca   : > { %v1762_v29 = vadd.f32 %v1761_v1, %v4369_v23  ;;  %v2343_v24 = vadd.f32 %v2342_v38, %v2002_v9  ;;  %v2052_v20 = vpop.permute.xlu1 %2051 }
 0x2cb   : > { %1834 = vst [vmem:[%s4199_s12 + $0x3d0] sm:$0xff] %v1760_v2  ;;  %2455 = vst [vmem:[%s4199_s12 + $0x530] sm:$0xff] %v2341_v30  ;;  %v2057_v2 = vpop.permute.xlu0 %2056 }
 0x2cc   : > { %1835 = vst [vmem:[%s4199_s12 + $0x3d8] sm:$0xff] %v1762_v29  ;;  %2456 = vst [vmem:[%s4199_s12 + $0x538] sm:$0xff] %v2343_v24  ;;  %v1765_v3 = vpop.f32.mrb[106].mxu0  ;;  %v2346_v50 = vpop.f32.mrb[82].mxu1 }
 0x2cd   : > { %v1766_v17 = vadd.f32 %v1765_v3, %v4379_v33  ;;  %v2347_v34 = vadd.f32 %v2346_v50, %v2007_v19  ;;  %v1767_v53 = vpop.f32.mrb[107].mxu0  ;;  %v2348_v46 = vpop.f32.mrb[83].mxu1 }
 0x2ce   : > { %v1768_v23 = vadd.f32 %v1767_v53, %v4379_v33  ;;  %v2349_v4 = vadd.f32 %v2348_v46, %v2007_v19  ;;  %v2062_v24 = vpop.permute.xlu1 %2061 }
 0x2cf   : > { %1836 = vst [vmem:[%s4199_s12 + $0x3e0] sm:$0xff] %v1766_v17  ;;  %2457 = vst [vmem:[%s4199_s12 + $0x540] sm:$0xff] %v2347_v34 }
 0x2d0   : > { %1837 = vst [vmem:[%s4199_s12 + $0x3e8] sm:$0xff] %v1768_v23  ;;  %2458 = vst [vmem:[%s4199_s12 + $0x548] sm:$0xff] %v2349_v4  ;;  %v1771_v43 = vpop.f32.mrb[108].mxu0  ;;  %v2352_v41 = vpop.f32.mrb[84].mxu1 }
 0x2d1   : > { %v1772_v21 = vadd.f32 %v1771_v43, %v4389_v49  ;;  %v2353_v7 = vadd.f32 %v2352_v41, %v2012_v35  ;;  %v1773_v5 = vpop.f32.mrb[109].mxu0  ;;  %v2354_v59 = vpop.f32.mrb[85].mxu1 }
 0x2d2   : > { %v1774_v33 = vadd.f32 %v1773_v5, %v4389_v49  ;;  %v2355_v62 = vadd.f32 %v2354_v59, %v2012_v35 }
 0x2d3   : > { %1838 = vst [vmem:[%s4199_s12 + $0x3f0] sm:$0xff] %v1772_v21  ;;  %2459 = vst [vmem:[%s4199_s12 + $0x550] sm:$0xff] %v2353_v7 }
 0x2d4   : > { %1839 = vst [vmem:[%s4199_s12 + $0x3f8] sm:$0xff] %v1774_v33  ;;  %2460 = vst [vmem:[%s4199_s12 + $0x558] sm:$0xff] %v2355_v62  ;;  %v2358_v58 = vpop.f32.mrb[86].mxu1 }
 0x2d5   : > { %v2359_v52 = vadd.f32 %v2358_v58, %v2017_v27  ;;  %v2360_v57 = vpop.f32.mrb[87].mxu1 }
 0x2d6   : > { %v2361_v45 = vadd.f32 %v2360_v57, %v2017_v27 }
 0x2d7   : > { %2461 = vst [vmem:[%s4199_s12 + $0x560] sm:$0xff] %v2359_v52 }
 0x2d8   : > { %2462 = vst [vmem:[%s4199_s12 + $0x568] sm:$0xff] %v2361_v45  ;;  %v2364_v40 = vpop.f32.mrb[88].mxu1 }
 0x2d9   : > { %v2365_v10 = vadd.f32 %v2364_v40, %v2022_v15  ;;  %v2366_v49 = vpop.f32.mrb[89].mxu1 }
 0x2da   : > { %v2367_v22 = vadd.f32 %v2366_v49, %v2022_v15 }
 0x2db   : > { %2463 = vst [vmem:[%s4199_s12 + $0x570] sm:$0xff] %v2365_v10 }
 0x2dc   : > { %2464 = vst [vmem:[%s4199_s12 + $0x578] sm:$0xff] %v2367_v22  ;;  %v2370_v44 = vpop.f32.mrb[90].mxu1 }
 0x2dd   : > { %v2371_v42 = vadd.f32 %v2370_v44, %v2027_v37  ;;  %v2372_v56 = vpop.f32.mrb[91].mxu1 }
 0x2de   : > { %v2373_v28 = vadd.f32 %v2372_v56, %v2027_v37 }
 0x2df   : > { %2465 = vst [vmem:[%s4199_s12 + $0x580] sm:$0xff] %v2371_v42 }
 0x2e0   : > { %2466 = vst [vmem:[%s4199_s12 + $0x588] sm:$0xff] %v2373_v28  ;;  %v2376_v48 = vpop.f32.mrb[92].mxu1 }
 0x2e1   : > { %v2377_v61 = vadd.f32 %v2376_v48, %v2032_v6  ;;  %v2378_v12 = vpop.f32.mrb[93].mxu1 }
 0x2e2   : > { %v2379_v63 = vadd.f32 %v2378_v12, %v2032_v6 }
 0x2e3   : > { %2467 = vst [vmem:[%s4199_s12 + $0x590] sm:$0xff] %v2377_v61 }
 0x2e4   : > { %2468 = vst [vmem:[%s4199_s12 + $0x598] sm:$0xff] %v2379_v63  ;;  %v2382_v60 = vpop.f32.mrb[94].mxu1 }
 0x2e5   : > { %v2383_v36 = vadd.f32 %v2382_v60, %v2037_v13  ;;  %v2384_v16 = vpop.f32.mrb[95].mxu1 }
 0x2e6   : > { %v2385_v8 = vadd.f32 %v2384_v16, %v2037_v13 }
 0x2e7   : > { %2469 = vst [vmem:[%s4199_s12 + $0x5a0] sm:$0xff] %v2383_v36 }
 0x2e8   : > { %2470 = vst [vmem:[%s4199_s12 + $0x5a8] sm:$0xff] %v2385_v8  ;;  %v2388_v18 = vpop.f32.mrb[96].mxu1 }
 0x2e9   : > { %v2389_v55 = vadd.f32 %v2388_v18, %v2042_v11  ;;  %v2390_v32 = vpop.f32.mrb[97].mxu1 }
 0x2ea   : > { %v2391_v47 = vadd.f32 %v2390_v32, %v2042_v11 }
 0x2eb   : > { %2471 = vst [vmem:[%s4199_s12 + $0x5b0] sm:$0xff] %v2389_v55 }
 0x2ec   : > { %2472 = vst [vmem:[%s4199_s12 + $0x5b8] sm:$0xff] %v2391_v47  ;;  %v2394_v54 = vpop.f32.mrb[98].mxu1 }
 0x2ed   : > { %v2395_v31 = vadd.f32 %v2394_v54, %v2047_v26  ;;  %v2396_v0 = vpop.f32.mrb[99].mxu1 }
 0x2ee   : > { %v2397_v14 = vadd.f32 %v2396_v0, %v2047_v26 }
 0x2ef   : > { %2473 = vst [vmem:[%s4199_s12 + $0x5c0] sm:$0xff] %v2395_v31 }
 0x2f0   : > { %2474 = vst [vmem:[%s4199_s12 + $0x5c8] sm:$0xff] %v2397_v14  ;;  %v2400_v39 = vpop.f32.mrb[100].mxu1 }
 0x2f1   : > { %v2401_v9 = vadd.f32 %v2400_v39, %v2052_v20  ;;  %v2402_v51 = vpop.f32.mrb[101].mxu1 }
 0x2f2   : > { %v2403_v25 = vadd.f32 %v2402_v51, %v2052_v20 }
 0x2f3   : > { %2475 = vst [vmem:[%s4199_s12 + $0x5d0] sm:$0xff] %v2401_v9 }
 0x2f4   : > { %2476 = vst [vmem:[%s4199_s12 + $0x5d8] sm:$0xff] %v2403_v25  ;;  %v2406_v30 = vpop.f32.mrb[102].mxu1 }
 0x2f5   : > { %v2407_v1 = vadd.f32 %v2406_v30, %v2057_v2  ;;  %v2408_v38 = vpop.f32.mrb[103].mxu1 }
 0x2f6   : > { %v2409_v29 = vadd.f32 %v2408_v38, %v2057_v2 }
 0x2f7   : > { %2477 = vst [vmem:[%s4199_s12 + $0x5e0] sm:$0xff] %v2407_v1 }
 0x2f8   : > { %2478 = vst [vmem:[%s4199_s12 + $0x5e8] sm:$0xff] %v2409_v29  ;;  %v2412_v19 = vpop.f32.mrb[104].mxu1 }
 0x2f9   : > { %v2413_v3 = vadd.f32 %v2412_v19, %v2062_v24  ;;  %v2414_v50 = vpop.f32.mrb[105].mxu1 }
 0x2fa   : > { %v2415_v17 = vadd.f32 %v2414_v50, %v2062_v24 }
 0x2fb   : > { %2479 = vst [vmem:[%s4199_s12 + $0x5f0] sm:$0xff] %v2413_v3 }
 0x2fc   : > { %2480 = vst [vmem:[%s4199_s12 + $0x5f8] sm:$0xff] %v2415_v17 }
 0x2fd   : > { %2915 = shalt.err (!%p2912_p4)
}
 0x2fe   : > { %s2916_s25 = scalar_lea.hbm %s4558_s24, 24576  ;;  %s2920_s11 = scalar_lea.hbm %s4616_s5, 49152 }
 0x2ff   : > { %p2917_p6 = scmp.ne.s32.totalorder %s4558_s24, %s2916_s25  ;;  %p2921_p12 = scmp.lt.u32.totalorder %s4558_s24, %s4616_s5 }
 0x300   : > { %p2922_p1 = scmp.lt.u32.totalorder %s2920_s11, %s2916_s25  ;;  %p2924_p8 = scmp.lt.u32.totalorder %s2916_s25, %s4558_s24 }
 0x301   : > { %p2918_p7 = pnand %p2917_p6, %p4624_p9 }
 0x302   : > { %p2923_p3 = por %p2922_p1, %p2921_p12 }
 0x303   : > { %p2919_p10 = pneg %p2918_p7 }
 0x304   : > { %p2925_p11 = por %p2924_p8, %p2923_p3 }
 0x306   : > { %p2926_p0 = pnand %p2925_p11, %p2919_p10 }
 0x308   : > { %2929 = shalt.err (!%p2926_p0)
}
 0x309   : > { %s2992_s10 = smov 256   ;;  %s2993_s17 = smov 16  }
 0x30a   : > { %2804 = dma.vmem_to_hbm [thread:$0]  (%p4624_p9), %s4560_s30, 24576, %s4558_s24, %s2482_s21, %s2992_s10, %s2992_s10, %s2993_s17  }
 0x30b PF: > { %s2512_s9 = sand.u32 1, %s2964_s18   ;;  %p4625_p5 = scmp.ne.s32.totalorder %s4621_s8, 0 }
 0x30c   : > { %p4626_p13 = scmp.ge.s32.totalorder %s2984_s23, 2  ;;  %s2513_s13 = scalar_lea.sflag [#allocation4], %s2512_s9 }
 0x30e   : > { %p2811_p2 = pnand %p4626_p13, %p4625_p5 }
 0x310   : > { %2959 = dma.done.wait (!%p2811_p2), %s2513_s13, 24576  }
 0x311   : > { %2961 = vsyncadd (!%p2811_p2), %s2513_s13, 4294942720  ;;  %s21_s23 = sadd.s32 1, %s2984_s23   ;;  %s4627_s18 = smov %s2968_s19 }
 0x312   : > { %p18_p4 = scmp.ge.s32.totalorder %s21_s23, 4   ;;  %s4628_s19 = smov %s2972_s20 }
 0x313   : > { %s4629_s20 = smov %s3080_s7  ;;  %s4630_s21 = smov %s2980_s22 }
 0x314   : > { %s4631_s22 = smov %s4633_s26  ;;  %20 = sbr.rel (!%p18_p4) target bundleno = 6 (0x6), region = 85 }
 0x31b   :  { %2518 = vsyncpa [#allocation3], 1 }
 0x31c   :  { %2520 = vsyncpa [#allocation3 + $0x1], 1 }
 0x31d   :  { %2521 = vsyncpa [#allocation4], 1 }
 0x31e   :  { %2523 = vsyncpa [#allocation4 + $0x1], 1 }

</bundles_post_ra>
